<compile_context>
chip_gen: v6e
topology: v6e:2x2x1
jax: 0.10.0
libtpu: 0.0.40
codegen_flags: <defaults>
</compile_context>

<pallas_src>
import functools

import numpy as np
import jax
import jax.numpy as jnp
from jax.experimental import pallas as pl
from jax.experimental.pallas import tpu as pltpu

EPS = 1e-5
LANE_PAD = 128  # 128-aligned halo for the conv2 lane-shift scratch (>= max |shift| = W+1)


# ---------------------------------------------------------------------------
# Fused kernel: the entire bottleneck block in one grid step.
# ---------------------------------------------------------------------------
def _fused_block_kernel(xt_ref, w1_ref, w2_ref, w3_ref,
                        g1_ref, b1_ref, g2_ref, b2_ref, g3_ref, b3_ref,
                        mask_ref, out_ref, pad_ref, *, img_w):
    """Transposed (C, M) layout, M = n*H*W + h*W + w on the lane axis.

    xt_ref  : (Cin, M)  f32   input activations (also the residual)
    w1_ref  : (C1, Cin) f32   1x1 conv1 weights
    w2_ref  : (9, C2, C1) f32 3x3 conv2 weights, tap index k = di*3 + dj
    w3_ref  : (C3, C2)  f32   1x1 conv3 weights
    g*/b*   : (C, 1)    f32   BatchNorm affine params
    mask_ref: (9, 1, M) f32   border-validity masks for the 9 conv2 taps
    out_ref : (C3, M)   f32
    pad_ref : (C1, M + 2*LANE_PAD) f32 scratch (zero-padded halo for conv2 shifts)
    """
    m_total = xt_ref.shape[1]
    inv_m = 1.0 / m_total

    def bn(y, g_ref, b_ref):
        # Training-mode BatchNorm: batch statistics, biased variance, two-pass
        # (centered) variance for numerical safety.  Reductions are cross-lane (XLU).
        mean = jnp.sum(y, axis=1, keepdims=True) * inv_m
        centered = y - mean
        var = jnp.sum(centered * centered, axis=1, keepdims=True) * inv_m
        scale = g_ref[...] * jax.lax.rsqrt(var + EPS)
        return centered * scale + b_ref[...]

    x = xt_ref[...]                                               # (Cin, M) f32

    # ---- stage 1: 1x1 conv -> BN -> ReLU  (bf16 MXU operands, f32 accumulate) ----
    y1 = jnp.dot(w1_ref[...].astype(jnp.bfloat16), x.astype(jnp.bfloat16),
                 preferred_element_type=jnp.float32)              # (C1, M)
    o1 = jnp.maximum(bn(y1, g1_ref, b1_ref), 0.0)

    # ---- stage 2: 3x3 conv (stride 1, pad 1) -> BN -> ReLU ----------------------
    # o1 is written once into a zero-padded lane scratch; each of the 9 taps is a
    # flat lane shift s = dh*W + dw, a small MXU matmul, and a border mask.  The
    # masks also kill every position whose flat shift would cross an image boundary,
    # so the flat-index trick is exact.
    pad_ref[...] = jnp.zeros_like(pad_ref)
    pad_ref[:, LANE_PAD:LANE_PAD + m_total] = o1                  # aligned store
    c2 = w2_ref.shape[1]
    y2 = jnp.zeros((c2, m_total), jnp.float32)
    k = 0
    for dh in (-1, 0, 1):
        for dw in (-1, 0, 1):
            s = dh * img_w + dw
            shifted = pad_ref[:, LANE_PAD + s:LANE_PAD + s + m_total]   # (C1, M)
            tap = jnp.dot(w2_ref[k].astype(jnp.bfloat16),
                          shifted.astype(jnp.bfloat16),
                          preferred_element_type=jnp.float32)           # (C2, M)
            y2 = y2 + tap * mask_ref[k]
            k += 1
    o2 = jnp.maximum(bn(y2, g2_ref, b2_ref), 0.0)

    # ---- stage 3: 1x1 conv -> BN -> + residual -> ReLU --------------------------
    y3 = jnp.dot(w3_ref[...].astype(jnp.bfloat16), o2.astype(jnp.bfloat16),
                 preferred_element_type=jnp.float32)              # (C3, M)
    out_ref[...] = jnp.maximum(bn(y3, g3_ref, b3_ref) + x, 0.0)


# ---------------------------------------------------------------------------
# Wrapper: layout plumbing (NCHW <-> lane-dense (C, M)) + the single pallas_call.
# ---------------------------------------------------------------------------
@functools.partial(jax.jit, static_argnames=("stride", "paddings", "ksizes"))
def resnet50_basic_block(x_nchw, params, stride, paddings, ksizes):
    N, Cin, H, W = x_nchw.shape
    C1 = params["w1"].shape[0]
    C2 = params["w2"].shape[0]
    C3 = params["w3"].shape[0]
    M = N * H * W

    # Fused kernel implements the (1, 3, 1) bottleneck with stride 1 and a
    # shape-preserving residual (the configuration this module is used with).
    assert ksizes == (1, 3, 1) and paddings == (0, 1, 0) and stride == 1
    assert C3 == Cin, "residual add requires outs[2] == in_channel"
    assert M % 128 == 0, "N*H*W must be a multiple of 128 for lane-dense tiling"

    x = x_nchw.astype(jnp.float32)
    # Transposed, lane-dense activation layout: (C, M), M = n*H*W + h*W + w.
    xt = jnp.transpose(x, (1, 0, 2, 3)).reshape(Cin, M)

    # Weight matrices (kept f32 at the HBM boundary — they are tiny; the kernel
    # casts MXU operands to bf16 internally).
    w1m = params["w1"][:, :, 0, 0]                                           # (C1, Cin)
    w2m = jnp.transpose(params["w2"], (2, 3, 0, 1)).reshape(9, C2, C1)       # (9, C2, C1)
    w3m = params["w3"][:, :, 0, 0]                                           # (C3, C2)

    g1 = params["g1"].reshape(C1, 1).astype(jnp.float32)
    b1 = params["b1"].reshape(C1, 1).astype(jnp.float32)
    g2 = params["g2"].reshape(C2, 1).astype(jnp.float32)
    b2 = params["b2"].reshape(C2, 1).astype(jnp.float32)
    g3 = params["g3"].reshape(C3, 1).astype(jnp.float32)
    b3 = params["b3"].reshape(C3, 1).astype(jnp.float32)

    # Precomputed border masks for the 9 conv2 taps (compile-time constants).
    midx = np.arange(M)
    hh = (midx % (H * W)) // W
    ww = midx % W
    masks = []
    for dh in (-1, 0, 1):
        for dw in (-1, 0, 1):
            valid = (hh + dh >= 0) & (hh + dh < H) & (ww + dw >= 0) & (ww + dw < W)
            masks.append(valid.astype(np.float32))
    mask = jnp.asarray(np.stack(masks).reshape(9, 1, M))

    kernel = functools.partial(_fused_block_kernel, img_w=W)
    out_t = pl.pallas_call(
        kernel,
        out_shape=jax.ShapeDtypeStruct((C3, M), jnp.float32),
        grid_spec=pltpu.PrefetchScalarGridSpec(
            num_scalar_prefetch=0,
            grid=(1,),  # everything fits in VMEM at this size -> single grid step
            in_specs=[
                pl.BlockSpec((Cin, M), lambda i: (0, 0)),        # xt
                pl.BlockSpec((C1, Cin), lambda i: (0, 0)),       # w1
                pl.BlockSpec((9, C2, C1), lambda i: (0, 0, 0)),  # w2 (9 taps)
                pl.BlockSpec((C3, C2), lambda i: (0, 0)),        # w3
                pl.BlockSpec((C1, 1), lambda i: (0, 0)),         # g1
                pl.BlockSpec((C1, 1), lambda i: (0, 0)),         # b1
                pl.BlockSpec((C2, 1), lambda i: (0, 0)),         # g2
                pl.BlockSpec((C2, 1), lambda i: (0, 0)),         # b2
                pl.BlockSpec((C3, 1), lambda i: (0, 0)),         # g3
                pl.BlockSpec((C3, 1), lambda i: (0, 0)),         # b3
                pl.BlockSpec((9, 1, M), lambda i: (0, 0, 0)),    # border masks
            ],
            out_specs=pl.BlockSpec((C3, M), lambda i: (0, 0)),
            scratch_shapes=[pltpu.VMEM((C1, M + 2 * LANE_PAD), jnp.float32)],
        ),
        compiler_params=pltpu.CompilerParams(dimension_semantics=("arbitrary",)),
    )(xt, w1m, w2m, w3m, g1, b1, g2, b2, g3, b3, mask)

    # (C3, M) -> NCHW
    return out_t.reshape(C3, N, H, W).transpose(1, 0, 2, 3)


# ---------------------------------------------------------------------------
# Pure-JAX reference (bf16 conv operands to match the kernel's MXU precision).
# ---------------------------------------------------------------------------
def _ref_forward(x_nchw, params, stride, paddings):
    def conv(inp, w, p):
        return jax.lax.conv_general_dilated(
            inp.astype(jnp.bfloat16), w.astype(jnp.bfloat16),
            window_strides=(stride, stride), padding=[(p, p), (p, p)],
            dimension_numbers=("NCHW", "OIHW", "NCHW"),
            preferred_element_type=jnp.float32)

    def bn(y, g, b):
        mean = jnp.mean(y, axis=(0, 2, 3), keepdims=True)
        var = jnp.var(y, axis=(0, 2, 3), keepdims=True)
        return ((y - mean) * jax.lax.rsqrt(var + EPS) * g.reshape(1, -1, 1, 1)
                + b.reshape(1, -1, 1, 1))

    x = x_nchw.astype(jnp.float32)
    out = jax.nn.relu(bn(conv(x, params["w1"], paddings[0]), params["g1"], params["b1"]))
    out = jax.nn.relu(bn(conv(out, params["w2"], paddings[1]), params["g2"], params["b2"]))
    out = bn(conv(out, params["w3"], paddings[2]), params["g3"], params["b3"])
    return jax.nn.relu(out + x)


# ---------------------------------------------------------------------------
if __name__ == "__main__":
    # Module config: ResNet50BasicBlock(in_channel=16, outs=[8, 8, 16],
    #                                   kernerl_size=[1, 3, 1], stride=[1], padding=[0, 1, 0])
    in_channel = 16
    outs = (8, 8, 16)
    ksizes = (1, 3, 1)
    stride = 1
    paddings = (0, 1, 0)
    N, H, W = 2, 16, 16

    k = jax.random.split(jax.random.PRNGKey(0), 9)
    params = {
        "w1": 0.1 * jax.random.normal(k[0], (outs[0], in_channel, ksizes[0], ksizes[0]), jnp.float32),
        "w2": 0.1 * jax.random.normal(k[1], (outs[1], outs[0], ksizes[1], ksizes[1]), jnp.float32),
        "w3": 0.1 * jax.random.normal(k[2], (outs[2], outs[1], ksizes[2], ksizes[2]), jnp.float32),
        "g1": 1.0 + 0.1 * jax.random.normal(k[3], (outs[0],), jnp.float32),
        "b1": 0.1 * jax.random.normal(k[4], (outs[0],), jnp.float32),
        "g2": 1.0 + 0.1 * jax.random.normal(k[5], (outs[1],), jnp.float32),
        "b2": 0.1 * jax.random.normal(k[6], (outs[1],), jnp.float32),
        "g3": jnp.ones((outs[2],), jnp.float32),
        "b3": jnp.zeros((outs[2],), jnp.float32),
    }
    x = jax.random.normal(k[8], (N, in_channel, H, W), jnp.float32)

    out = jax.block_until_ready(
        resnet50_basic_block(x, params, stride=stride, paddings=paddings, ksizes=ksizes))
    ref = jax.block_until_ready(_ref_forward(x, params, stride, paddings))

    assert out.shape == (N, in_channel, H, W), out.shape
    max_err = float(jnp.max(jnp.abs(out - ref)))
    assert jnp.allclose(out, ref, atol=3e-3, rtol=3e-3), max_err

    print("KERNEL_OK")
</pallas_src>

<mosaic_0001>
module attributes {stable_mosaic.version = 11 : i64} {
  func.func @_fused_block_kernel(%arg0: i32, %arg1: memref<16x512xf32, #tpu.memory_space<vmem>>, %arg2: memref<8x16xf32, #tpu.memory_space<vmem>>, %arg3: memref<9x8x8xf32, #tpu.memory_space<vmem>>, %arg4: memref<16x8xf32, #tpu.memory_space<vmem>>, %arg5: memref<8x1xf32, #tpu.memory_space<vmem>>, %arg6: memref<8x1xf32, #tpu.memory_space<vmem>>, %arg7: memref<8x1xf32, #tpu.memory_space<vmem>>, %arg8: memref<8x1xf32, #tpu.memory_space<vmem>>, %arg9: memref<16x1xf32, #tpu.memory_space<vmem>>, %arg10: memref<16x1xf32, #tpu.memory_space<vmem>>, %arg11: memref<9x1x512xf32, #tpu.memory_space<vmem>>, %arg12: memref<16x512xf32, #tpu.memory_space<vmem>>, %arg13: memref<8x768xf32, #tpu.memory_space<vmem>>) attributes {dimension_semantics = [#tpu.dimension_semantics<arbitrary>], iteration_bounds = array<i64: 1>, scalar_prefetch = 0 : i64, scratch_operands = 1 : i64, tpu.core_type = #tpu.core_type<tc>, window_params = [{pipeline_mode = #tpu.pipeline_mode<synchronous>, transform_indices = @transform_0, window_bounds = array<i64: 16, 512>}, {pipeline_mode = #tpu.pipeline_mode<synchronous>, transform_indices = @transform_1, window_bounds = array<i64: 8, 16>}, {pipeline_mode = #tpu.pipeline_mode<synchronous>, transform_indices = @transform_2, window_bounds = array<i64: 9, 8, 8>}, {pipeline_mode = #tpu.pipeline_mode<synchronous>, transform_indices = @transform_3, window_bounds = array<i64: 16, 8>}, {pipeline_mode = #tpu.pipeline_mode<synchronous>, transform_indices = @transform_4, window_bounds = array<i64: 8, 1>}, {pipeline_mode = #tpu.pipeline_mode<synchronous>, transform_indices = @transform_5, window_bounds = array<i64: 8, 1>}, {pipeline_mode = #tpu.pipeline_mode<synchronous>, transform_indices = @transform_6, window_bounds = array<i64: 8, 1>}, {pipeline_mode = #tpu.pipeline_mode<synchronous>, transform_indices = @transform_7, window_bounds = array<i64: 8, 1>}, {pipeline_mode = #tpu.pipeline_mode<synchronous>, transform_indices = @transform_8, window_bounds = array<i64: 16, 1>}, {pipeline_mode = #tpu.pipeline_mode<synchronous>, transform_indices = @transform_9, window_bounds = array<i64: 16, 1>}, {pipeline_mode = #tpu.pipeline_mode<synchronous>, transform_indices = @transform_10, window_bounds = array<i64: 9, 1, 512>}, {pipeline_mode = #tpu.pipeline_mode<synchronous>, transform_indices = @transform_11, window_bounds = array<i64: 16, 512>}]} {
    %c0 = arith.constant 0 : index
    %c0_0 = arith.constant 0 : index
    %0 = vector.load %arg1[%c0, %c0_0] : memref<16x512xf32, #tpu.memory_space<vmem>>, vector<16x512xf32>
    %c0_1 = arith.constant 0 : index
    %c0_2 = arith.constant 0 : index
    %1 = vector.load %arg2[%c0_1, %c0_2] : memref<8x16xf32, #tpu.memory_space<vmem>>, vector<8x16xf32>
    %2 = arith.truncf %1 : vector<8x16xf32> to vector<8x16xbf16>
    %3 = arith.truncf %0 : vector<16x512xf32> to vector<16x512xbf16>
    %cst = arith.constant dense<0.000000e+00> : vector<8x512xf32>
    %4 = tpu.matmul %2, %3, %cst {dimension_numbers = #tpu.dot_dimension_numbers<[1], [0], [0], [1], [0, 0, 1, 1], [], []>} : vector<8x16xbf16>, vector<16x512xbf16>, vector<8x512xf32> -> vector<8x512xf32>
    %cst_3 = arith.constant dense<0.000000e+00> : vector<8xf32>
    %5 = vector.multi_reduction <add>, %4, %cst_3 [1] : vector<8x512xf32> to vector<8xf32>
    %6 = vector.shape_cast %5 : vector<8xf32> to vector<8x1xf32>
    %cst_4 = arith.constant 0.001953125 : f32
    %7 = vector.broadcast %cst_4 : f32 to vector<8x1xf32>
    %8 = arith.mulf %6, %7 : vector<8x1xf32>
    %9 = vector.broadcast %8 : vector<8x1xf32> to vector<8x512xf32>
    %10 = arith.subf %4, %9 : vector<8x512xf32>
    %11 = arith.mulf %10, %10 : vector<8x512xf32>
    %cst_5 = arith.constant dense<0.000000e+00> : vector<8xf32>
    %12 = vector.multi_reduction <add>, %11, %cst_5 [1] : vector<8x512xf32> to vector<8xf32>
    %13 = vector.shape_cast %12 : vector<8xf32> to vector<8x1xf32>
    %cst_6 = arith.constant 0.001953125 : f32
    %14 = vector.broadcast %cst_6 : f32 to vector<8x1xf32>
    %15 = arith.mulf %13, %14 : vector<8x1xf32>
    %c0_7 = arith.constant 0 : index
    %c0_8 = arith.constant 0 : index
    %16 = vector.load %arg5[%c0_7, %c0_8] : memref<8x1xf32, #tpu.memory_space<vmem>>, vector<8x1xf32>
    %cst_9 = arith.constant 9.99999974E-6 : f32
    %17 = vector.broadcast %cst_9 : f32 to vector<8x1xf32>
    %18 = arith.addf %15, %17 : vector<8x1xf32>
    %19 = math.rsqrt %18 : vector<8x1xf32>
    %20 = arith.mulf %16, %19 : vector<8x1xf32>
    %21 = vector.broadcast %20 : vector<8x1xf32> to vector<8x512xf32>
    %22 = arith.mulf %10, %21 : vector<8x512xf32>
    %c0_10 = arith.constant 0 : index
    %c0_11 = arith.constant 0 : index
    %23 = vector.load %arg6[%c0_10, %c0_11] : memref<8x1xf32, #tpu.memory_space<vmem>>, vector<8x1xf32>
    %24 = vector.broadcast %23 : vector<8x1xf32> to vector<8x512xf32>
    %25 = arith.addf %22, %24 : vector<8x512xf32>
    %cst_12 = arith.constant 0.000000e+00 : f32
    %26 = vector.broadcast %cst_12 : f32 to vector<8x512xf32>
    %27 = arith.maximumf %25, %26 : vector<8x512xf32>
    %cst_13 = arith.constant 0.000000e+00 : f32
    %28 = vector.broadcast %cst_13 : f32 to vector<8x768xf32>
    %c0_14 = arith.constant 0 : index
    %c0_15 = arith.constant 0 : index
    %29 = vector.load %arg13[%c0_14, %c0_15] : memref<8x768xf32, #tpu.memory_space<vmem>>, vector<8x768xf32>
    tpu.vector_store %arg13[%c0_14, %c0_15], %28 {strides = array<i32>} : memref<8x768xf32, #tpu.memory_space<vmem>>, vector<8x768xf32>,
    %c0_16 = arith.constant 0 : index
    %c128 = arith.constant 128 : index
    %30 = vector.load %arg13[%c0_16, %c128] : memref<8x768xf32, #tpu.memory_space<vmem>>, vector<8x512xf32>
    tpu.vector_store %arg13[%c0_16, %c128], %27 {strides = array<i32>} : memref<8x768xf32, #tpu.memory_space<vmem>>, vector<8x512xf32>,
    %cst_17 = arith.constant 0.000000e+00 : f32
    %31 = vector.broadcast %cst_17 : f32 to vector<8x512xf32>
    %c0_18 = arith.constant 0 : index
    %c111 = arith.constant 111 : index
    %32 = vector.load %arg13[%c0_18, %c111] : memref<8x768xf32, #tpu.memory_space<vmem>>, vector<8x512xf32>
    %c0_19 = arith.constant 0 : index
    %c0_20 = arith.constant 0 : index
    %c0_21 = arith.constant 0 : index
    %33 = vector.load %arg3[%c0_19, %c0_20, %c0_21] : memref<9x8x8xf32, #tpu.memory_space<vmem>>, vector<1x8x8xf32>
    %34 = vector.shape_cast %33 : vector<1x8x8xf32> to vector<8x8xf32>
    %35 = arith.truncf %34 : vector<8x8xf32> to vector<8x8xbf16>
    %36 = arith.truncf %32 : vector<8x512xf32> to vector<8x512xbf16>
    %cst_22 = arith.constant dense<0.000000e+00> : vector<8x512xf32>
    %37 = tpu.matmul %35, %36, %cst_22 {dimension_numbers = #tpu.dot_dimension_numbers<[1], [0], [0], [1], [0, 0, 1, 1], [], []>} : vector<8x8xbf16>, vector<8x512xbf16>, vector<8x512xf32> -> vector<8x512xf32>
    %c0_23 = arith.constant 0 : index
    %c0_24 = arith.constant 0 : index
    %c0_25 = arith.constant 0 : index
    %38 = vector.load %arg11[%c0_23, %c0_24, %c0_25] : memref<9x1x512xf32, #tpu.memory_space<vmem>>, vector<1x1x512xf32>
    %39 = vector.shape_cast %38 : vector<1x1x512xf32> to vector<1x512xf32>
    %40 = vector.broadcast %39 : vector<1x512xf32> to vector<8x512xf32>
    %41 = arith.mulf %37, %40 : vector<8x512xf32>
    %42 = arith.addf %31, %41 : vector<8x512xf32>
    %c0_26 = arith.constant 0 : index
    %c112 = arith.constant 112 : index
    %43 = vector.load %arg13[%c0_26, %c112] : memref<8x768xf32, #tpu.memory_space<vmem>>, vector<8x512xf32>
    %c1 = arith.constant 1 : index
    %c0_27 = arith.constant 0 : index
    %c0_28 = arith.constant 0 : index
    %44 = vector.load %arg3[%c1, %c0_27, %c0_28] : memref<9x8x8xf32, #tpu.memory_space<vmem>>, vector<1x8x8xf32>
    %45 = vector.shape_cast %44 : vector<1x8x8xf32> to vector<8x8xf32>
    %46 = arith.truncf %45 : vector<8x8xf32> to vector<8x8xbf16>
    %47 = arith.truncf %43 : vector<8x512xf32> to vector<8x512xbf16>
    %cst_29 = arith.constant dense<0.000000e+00> : vector<8x512xf32>
    %48 = tpu.matmul %46, %47, %cst_29 {dimension_numbers = #tpu.dot_dimension_numbers<[1], [0], [0], [1], [0, 0, 1, 1], [], []>} : vector<8x8xbf16>, vector<8x512xbf16>, vector<8x512xf32> -> vector<8x512xf32>
    %c1_30 = arith.constant 1 : index
    %c0_31 = arith.constant 0 : index
    %c0_32 = arith.constant 0 : index
    %49 = vector.load %arg11[%c1_30, %c0_31, %c0_32] : memref<9x1x512xf32, #tpu.memory_space<vmem>>, vector<1x1x512xf32>
    %50 = vector.shape_cast %49 : vector<1x1x512xf32> to vector<1x512xf32>
    %51 = vector.broadcast %50 : vector<1x512xf32> to vector<8x512xf32>
    %52 = arith.mulf %48, %51 : vector<8x512xf32>
    %53 = arith.addf %42, %52 : vector<8x512xf32>
    %c0_33 = arith.constant 0 : index
    %c113 = arith.constant 113 : index
    %54 = vector.load %arg13[%c0_33, %c113] : memref<8x768xf32, #tpu.memory_space<vmem>>, vector<8x512xf32>
    %c2 = arith.constant 2 : index
    %c0_34 = arith.constant 0 : index
    %c0_35 = arith.constant 0 : index
    %55 = vector.load %arg3[%c2, %c0_34, %c0_35] : memref<9x8x8xf32, #tpu.memory_space<vmem>>, vector<1x8x8xf32>
    %56 = vector.shape_cast %55 : vector<1x8x8xf32> to vector<8x8xf32>
    %57 = arith.truncf %56 : vector<8x8xf32> to vector<8x8xbf16>
    %58 = arith.truncf %54 : vector<8x512xf32> to vector<8x512xbf16>
    %cst_36 = arith.constant dense<0.000000e+00> : vector<8x512xf32>
    %59 = tpu.matmul %57, %58, %cst_36 {dimension_numbers = #tpu.dot_dimension_numbers<[1], [0], [0], [1], [0, 0, 1, 1], [], []>} : vector<8x8xbf16>, vector<8x512xbf16>, vector<8x512xf32> -> vector<8x512xf32>
    %c2_37 = arith.constant 2 : index
    %c0_38 = arith.constant 0 : index
    %c0_39 = arith.constant 0 : index
    %60 = vector.load %arg11[%c2_37, %c0_38, %c0_39] : memref<9x1x512xf32, #tpu.memory_space<vmem>>, vector<1x1x512xf32>
    %61 = vector.shape_cast %60 : vector<1x1x512xf32> to vector<1x512xf32>
    %62 = vector.broadcast %61 : vector<1x512xf32> to vector<8x512xf32>
    %63 = arith.mulf %59, %62 : vector<8x512xf32>
    %64 = arith.addf %53, %63 : vector<8x512xf32>
    %c0_40 = arith.constant 0 : index
    %c127 = arith.constant 127 : index
    %65 = vector.load %arg13[%c0_40, %c127] : memref<8x768xf32, #tpu.memory_space<vmem>>, vector<8x512xf32>
    %c3 = arith.constant 3 : index
    %c0_41 = arith.constant 0 : index
    %c0_42 = arith.constant 0 : index
    %66 = vector.load %arg3[%c3, %c0_41, %c0_42] : memref<9x8x8xf32, #tpu.memory_space<vmem>>, vector<1x8x8xf32>
    %67 = vector.shape_cast %66 : vector<1x8x8xf32> to vector<8x8xf32>
    %68 = arith.truncf %67 : vector<8x8xf32> to vector<8x8xbf16>
    %69 = arith.truncf %65 : vector<8x512xf32> to vector<8x512xbf16>
    %cst_43 = arith.constant dense<0.000000e+00> : vector<8x512xf32>
    %70 = tpu.matmul %68, %69, %cst_43 {dimension_numbers = #tpu.dot_dimension_numbers<[1], [0], [0], [1], [0, 0, 1, 1], [], []>} : vector<8x8xbf16>, vector<8x512xbf16>, vector<8x512xf32> -> vector<8x512xf32>
    %c3_44 = arith.constant 3 : index
    %c0_45 = arith.constant 0 : index
    %c0_46 = arith.constant 0 : index
    %71 = vector.load %arg11[%c3_44, %c0_45, %c0_46] : memref<9x1x512xf32, #tpu.memory_space<vmem>>, vector<1x1x512xf32>
    %72 = vector.shape_cast %71 : vector<1x1x512xf32> to vector<1x512xf32>
    %73 = vector.broadcast %72 : vector<1x512xf32> to vector<8x512xf32>
    %74 = arith.mulf %70, %73 : vector<8x512xf32>
    %75 = arith.addf %64, %74 : vector<8x512xf32>
    %c0_47 = arith.constant 0 : index
    %c128_48 = arith.constant 128 : index
    %76 = vector.load %arg13[%c0_47, %c128_48] : memref<8x768xf32, #tpu.memory_space<vmem>>, vector<8x512xf32>
    %c4 = arith.constant 4 : index
    %c0_49 = arith.constant 0 : index
    %c0_50 = arith.constant 0 : index
    %77 = vector.load %arg3[%c4, %c0_49, %c0_50] : memref<9x8x8xf32, #tpu.memory_space<vmem>>, vector<1x8x8xf32>
    %78 = vector.shape_cast %77 : vector<1x8x8xf32> to vector<8x8xf32>
    %79 = arith.truncf %78 : vector<8x8xf32> to vector<8x8xbf16>
    %80 = arith.truncf %76 : vector<8x512xf32> to vector<8x512xbf16>
    %cst_51 = arith.constant dense<0.000000e+00> : vector<8x512xf32>
    %81 = tpu.matmul %79, %80, %cst_51 {dimension_numbers = #tpu.dot_dimension_numbers<[1], [0], [0], [1], [0, 0, 1, 1], [], []>} : vector<8x8xbf16>, vector<8x512xbf16>, vector<8x512xf32> -> vector<8x512xf32>
    %c4_52 = arith.constant 4 : index
    %c0_53 = arith.constant 0 : index
    %c0_54 = arith.constant 0 : index
    %82 = vector.load %arg11[%c4_52, %c0_53, %c0_54] : memref<9x1x512xf32, #tpu.memory_space<vmem>>, vector<1x1x512xf32>
    %83 = vector.shape_cast %82 : vector<1x1x512xf32> to vector<1x512xf32>
    %84 = vector.broadcast %83 : vector<1x512xf32> to vector<8x512xf32>
    %85 = arith.mulf %81, %84 : vector<8x512xf32>
    %86 = arith.addf %75, %85 : vector<8x512xf32>
    %c0_55 = arith.constant 0 : index
    %c129 = arith.constant 129 : index
    %87 = vector.load %arg13[%c0_55, %c129] : memref<8x768xf32, #tpu.memory_space<vmem>>, vector<8x512xf32>
    %c5 = arith.constant 5 : index
    %c0_56 = arith.constant 0 : index
    %c0_57 = arith.constant 0 : index
    %88 = vector.load %arg3[%c5, %c0_56, %c0_57] : memref<9x8x8xf32, #tpu.memory_space<vmem>>, vector<1x8x8xf32>
    %89 = vector.shape_cast %88 : vector<1x8x8xf32> to vector<8x8xf32>
    %90 = arith.truncf %89 : vector<8x8xf32> to vector<8x8xbf16>
    %91 = arith.truncf %87 : vector<8x512xf32> to vector<8x512xbf16>
    %cst_58 = arith.constant dense<0.000000e+00> : vector<8x512xf32>
    %92 = tpu.matmul %90, %91, %cst_58 {dimension_numbers = #tpu.dot_dimension_numbers<[1], [0], [0], [1], [0, 0, 1, 1], [], []>} : vector<8x8xbf16>, vector<8x512xbf16>, vector<8x512xf32> -> vector<8x512xf32>
    %c5_59 = arith.constant 5 : index
    %c0_60 = arith.constant 0 : index
    %c0_61 = arith.constant 0 : index
    %93 = vector.load %arg11[%c5_59, %c0_60, %c0_61] : memref<9x1x512xf32, #tpu.memory_space<vmem>>, vector<1x1x512xf32>
    %94 = vector.shape_cast %93 : vector<1x1x512xf32> to vector<1x512xf32>
    %95 = vector.broadcast %94 : vector<1x512xf32> to vector<8x512xf32>
    %96 = arith.mulf %92, %95 : vector<8x512xf32>
    %97 = arith.addf %86, %96 : vector<8x512xf32>
    %c0_62 = arith.constant 0 : index
    %c143 = arith.constant 143 : index
    %98 = vector.load %arg13[%c0_62, %c143] : memref<8x768xf32, #tpu.memory_space<vmem>>, vector<8x512xf32>
    %c6 = arith.constant 6 : index
    %c0_63 = arith.constant 0 : index
    %c0_64 = arith.constant 0 : index
    %99 = vector.load %arg3[%c6, %c0_63, %c0_64] : memref<9x8x8xf32, #tpu.memory_space<vmem>>, vector<1x8x8xf32>
    %100 = vector.shape_cast %99 : vector<1x8x8xf32> to vector<8x8xf32>
    %101 = arith.truncf %100 : vector<8x8xf32> to vector<8x8xbf16>
    %102 = arith.truncf %98 : vector<8x512xf32> to vector<8x512xbf16>
    %cst_65 = arith.constant dense<0.000000e+00> : vector<8x512xf32>
    %103 = tpu.matmul %101, %102, %cst_65 {dimension_numbers = #tpu.dot_dimension_numbers<[1], [0], [0], [1], [0, 0, 1, 1], [], []>} : vector<8x8xbf16>, vector<8x512xbf16>, vector<8x512xf32> -> vector<8x512xf32>
    %c6_66 = arith.constant 6 : index
    %c0_67 = arith.constant 0 : index
    %c0_68 = arith.constant 0 : index
    %104 = vector.load %arg11[%c6_66, %c0_67, %c0_68] : memref<9x1x512xf32, #tpu.memory_space<vmem>>, vector<1x1x512xf32>
    %105 = vector.shape_cast %104 : vector<1x1x512xf32> to vector<1x512xf32>
    %106 = vector.broadcast %105 : vector<1x512xf32> to vector<8x512xf32>
    %107 = arith.mulf %103, %106 : vector<8x512xf32>
    %108 = arith.addf %97, %107 : vector<8x512xf32>
    %c0_69 = arith.constant 0 : index
    %c144 = arith.constant 144 : index
    %109 = vector.load %arg13[%c0_69, %c144] : memref<8x768xf32, #tpu.memory_space<vmem>>, vector<8x512xf32>
    %c7 = arith.constant 7 : index
    %c0_70 = arith.constant 0 : index
    %c0_71 = arith.constant 0 : index
    %110 = vector.load %arg3[%c7, %c0_70, %c0_71] : memref<9x8x8xf32, #tpu.memory_space<vmem>>, vector<1x8x8xf32>
    %111 = vector.shape_cast %110 : vector<1x8x8xf32> to vector<8x8xf32>
    %112 = arith.truncf %111 : vector<8x8xf32> to vector<8x8xbf16>
    %113 = arith.truncf %109 : vector<8x512xf32> to vector<8x512xbf16>
    %cst_72 = arith.constant dense<0.000000e+00> : vector<8x512xf32>
    %114 = tpu.matmul %112, %113, %cst_72 {dimension_numbers = #tpu.dot_dimension_numbers<[1], [0], [0], [1], [0, 0, 1, 1], [], []>} : vector<8x8xbf16>, vector<8x512xbf16>, vector<8x512xf32> -> vector<8x512xf32>
    %c7_73 = arith.constant 7 : index
    %c0_74 = arith.constant 0 : index
    %c0_75 = arith.constant 0 : index
    %115 = vector.load %arg11[%c7_73, %c0_74, %c0_75] : memref<9x1x512xf32, #tpu.memory_space<vmem>>, vector<1x1x512xf32>
    %116 = vector.shape_cast %115 : vector<1x1x512xf32> to vector<1x512xf32>
    %117 = vector.broadcast %116 : vector<1x512xf32> to vector<8x512xf32>
    %118 = arith.mulf %114, %117 : vector<8x512xf32>
    %119 = arith.addf %108, %118 : vector<8x512xf32>
    %c0_76 = arith.constant 0 : index
    %c145 = arith.constant 145 : index
    %120 = vector.load %arg13[%c0_76, %c145] : memref<8x768xf32, #tpu.memory_space<vmem>>, vector<8x512xf32>
    %c8 = arith.constant 8 : index
    %c0_77 = arith.constant 0 : index
    %c0_78 = arith.constant 0 : index
    %121 = vector.load %arg3[%c8, %c0_77, %c0_78] : memref<9x8x8xf32, #tpu.memory_space<vmem>>, vector<1x8x8xf32>
    %122 = vector.shape_cast %121 : vector<1x8x8xf32> to vector<8x8xf32>
    %123 = arith.truncf %122 : vector<8x8xf32> to vector<8x8xbf16>
    %124 = arith.truncf %120 : vector<8x512xf32> to vector<8x512xbf16>
    %cst_79 = arith.constant dense<0.000000e+00> : vector<8x512xf32>
    %125 = tpu.matmul %123, %124, %cst_79 {dimension_numbers = #tpu.dot_dimension_numbers<[1], [0], [0], [1], [0, 0, 1, 1], [], []>} : vector<8x8xbf16>, vector<8x512xbf16>, vector<8x512xf32> -> vector<8x512xf32>
    %c8_80 = arith.constant 8 : index
    %c0_81 = arith.constant 0 : index
    %c0_82 = arith.constant 0 : index
    %126 = vector.load %arg11[%c8_80, %c0_81, %c0_82] : memref<9x1x512xf32, #tpu.memory_space<vmem>>, vector<1x1x512xf32>
    %127 = vector.shape_cast %126 : vector<1x1x512xf32> to vector<1x512xf32>
    %128 = vector.broadcast %127 : vector<1x512xf32> to vector<8x512xf32>
    %129 = arith.mulf %125, %128 : vector<8x512xf32>
    %130 = arith.addf %119, %129 : vector<8x512xf32>
    %cst_83 = arith.constant dense<0.000000e+00> : vector<8xf32>
    %131 = vector.multi_reduction <add>, %130, %cst_83 [1] : vector<8x512xf32> to vector<8xf32>
    %132 = vector.shape_cast %131 : vector<8xf32> to vector<8x1xf32>
    %cst_84 = arith.constant 0.001953125 : f32
    %133 = vector.broadcast %cst_84 : f32 to vector<8x1xf32>
    %134 = arith.mulf %132, %133 : vector<8x1xf32>
    %135 = vector.broadcast %134 : vector<8x1xf32> to vector<8x512xf32>
    %136 = arith.subf %130, %135 : vector<8x512xf32>
    %137 = arith.mulf %136, %136 : vector<8x512xf32>
    %cst_85 = arith.constant dense<0.000000e+00> : vector<8xf32>
    %138 = vector.multi_reduction <add>, %137, %cst_85 [1] : vector<8x512xf32> to vector<8xf32>
    %139 = vector.shape_cast %138 : vector<8xf32> to vector<8x1xf32>
    %cst_86 = arith.constant 0.001953125 : f32
    %140 = vector.broadcast %cst_86 : f32 to vector<8x1xf32>
    %141 = arith.mulf %139, %140 : vector<8x1xf32>
    %c0_87 = arith.constant 0 : index
    %c0_88 = arith.constant 0 : index
    %142 = vector.load %arg7[%c0_87, %c0_88] : memref<8x1xf32, #tpu.memory_space<vmem>>, vector<8x1xf32>
    %cst_89 = arith.constant 9.99999974E-6 : f32
    %143 = vector.broadcast %cst_89 : f32 to vector<8x1xf32>
    %144 = arith.addf %141, %143 : vector<8x1xf32>
    %145 = math.rsqrt %144 : vector<8x1xf32>
    %146 = arith.mulf %142, %145 : vector<8x1xf32>
    %147 = vector.broadcast %146 : vector<8x1xf32> to vector<8x512xf32>
    %148 = arith.mulf %136, %147 : vector<8x512xf32>
    %c0_90 = arith.constant 0 : index
    %c0_91 = arith.constant 0 : index
    %149 = vector.load %arg8[%c0_90, %c0_91] : memref<8x1xf32, #tpu.memory_space<vmem>>, vector<8x1xf32>
    %150 = vector.broadcast %149 : vector<8x1xf32> to vector<8x512xf32>
    %151 = arith.addf %148, %150 : vector<8x512xf32>
    %cst_92 = arith.constant 0.000000e+00 : f32
    %152 = vector.broadcast %cst_92 : f32 to vector<8x512xf32>
    %153 = arith.maximumf %151, %152 : vector<8x512xf32>
    %c0_93 = arith.constant 0 : index
    %c0_94 = arith.constant 0 : index
    %154 = vector.load %arg4[%c0_93, %c0_94] : memref<16x8xf32, #tpu.memory_space<vmem>>, vector<16x8xf32>
    %155 = arith.truncf %154 : vector<16x8xf32> to vector<16x8xbf16>
    %156 = arith.truncf %153 : vector<8x512xf32> to vector<8x512xbf16>
    %cst_95 = arith.constant dense<0.000000e+00> : vector<16x512xf32>
    %157 = tpu.matmul %155, %156, %cst_95 {dimension_numbers = #tpu.dot_dimension_numbers<[1], [0], [0], [1], [0, 0, 1, 1], [], []>} : vector<16x8xbf16>, vector<8x512xbf16>, vector<16x512xf32> -> vector<16x512xf32>
    %cst_96 = arith.constant dense<0.000000e+00> : vector<16xf32>
    %158 = vector.multi_reduction <add>, %157, %cst_96 [1] : vector<16x512xf32> to vector<16xf32>
    %159 = vector.shape_cast %158 : vector<16xf32> to vector<16x1xf32>
    %cst_97 = arith.constant 0.001953125 : f32
    %160 = vector.broadcast %cst_97 : f32 to vector<16x1xf32>
    %161 = arith.mulf %159, %160 : vector<16x1xf32>
    %162 = vector.broadcast %161 : vector<16x1xf32> to vector<16x512xf32>
    %163 = arith.subf %157, %162 : vector<16x512xf32>
    %164 = arith.mulf %163, %163 : vector<16x512xf32>
    %cst_98 = arith.constant dense<0.000000e+00> : vector<16xf32>
    %165 = vector.multi_reduction <add>, %164, %cst_98 [1] : vector<16x512xf32> to vector<16xf32>
    %166 = vector.shape_cast %165 : vector<16xf32> to vector<16x1xf32>
    %cst_99 = arith.constant 0.001953125 : f32
    %167 = vector.broadcast %cst_99 : f32 to vector<16x1xf32>
    %168 = arith.mulf %166, %167 : vector<16x1xf32>
    %c0_100 = arith.constant 0 : index
    %c0_101 = arith.constant 0 : index
    %169 = vector.load %arg9[%c0_100, %c0_101] : memref<16x1xf32, #tpu.memory_space<vmem>>, vector<16x1xf32>
    %cst_102 = arith.constant 9.99999974E-6 : f32
    %170 = vector.broadcast %cst_102 : f32 to vector<16x1xf32>
    %171 = arith.addf %168, %170 : vector<16x1xf32>
    %172 = math.rsqrt %171 : vector<16x1xf32>
    %173 = arith.mulf %169, %172 : vector<16x1xf32>
    %174 = vector.broadcast %173 : vector<16x1xf32> to vector<16x512xf32>
    %175 = arith.mulf %163, %174 : vector<16x512xf32>
    %c0_103 = arith.constant 0 : index
    %c0_104 = arith.constant 0 : index
    %176 = vector.load %arg10[%c0_103, %c0_104] : memref<16x1xf32, #tpu.memory_space<vmem>>, vector<16x1xf32>
    %177 = vector.broadcast %176 : vector<16x1xf32> to vector<16x512xf32>
    %178 = arith.addf %175, %177 : vector<16x512xf32>
    %179 = arith.addf %178, %0 : vector<16x512xf32>
    %cst_105 = arith.constant 0.000000e+00 : f32
    %180 = vector.broadcast %cst_105 : f32 to vector<16x512xf32>
    %181 = arith.maximumf %179, %180 : vector<16x512xf32>
    %c0_106 = arith.constant 0 : index
    %c0_107 = arith.constant 0 : index
    %182 = vector.load %arg12[%c0_106, %c0_107] : memref<16x512xf32, #tpu.memory_space<vmem>>, vector<16x512xf32>
    tpu.vector_store %arg12[%c0_106, %c0_107], %181 {strides = array<i32>} : memref<16x512xf32, #tpu.memory_space<vmem>>, vector<16x512xf32>,
    return
  }
  func.func @transform_0(%arg0: i32) -> (i32, i32) {
    %c0_i32 = arith.constant 0 : i32
    %c0_i32_0 = arith.constant 0 : i32
    %c0_i32_1 = arith.constant 0 : i32
    return %c0_i32, %c0_i32_0 : i32, i32
  }
  func.func @transform_1(%arg0: i32) -> (i32, i32) {
    %c0_i32 = arith.constant 0 : i32
    %c0_i32_0 = arith.constant 0 : i32
    %c0_i32_1 = arith.constant 0 : i32
    return %c0_i32, %c0_i32_0 : i32, i32
  }
  func.func @transform_2(%arg0: i32) -> (i32, i32, i32) {
    %c0_i32 = arith.constant 0 : i32
    %c0_i32_0 = arith.constant 0 : i32
    %c0_i32_1 = arith.constant 0 : i32
    %c0_i32_2 = arith.constant 0 : i32
    return %c0_i32, %c0_i32_0, %c0_i32_1 : i32, i32, i32
  }
  func.func @transform_3(%arg0: i32) -> (i32, i32) {
    %c0_i32 = arith.constant 0 : i32
    %c0_i32_0 = arith.constant 0 : i32
    %c0_i32_1 = arith.constant 0 : i32
    return %c0_i32, %c0_i32_0 : i32, i32
  }
  func.func @transform_4(%arg0: i32) -> (i32, i32) {
    %c0_i32 = arith.constant 0 : i32
    %c0_i32_0 = arith.constant 0 : i32
    %c0_i32_1 = arith.constant 0 : i32
    return %c0_i32, %c0_i32_0 : i32, i32
  }
  func.func @transform_5(%arg0: i32) -> (i32, i32) {
    %c0_i32 = arith.constant 0 : i32
    %c0_i32_0 = arith.constant 0 : i32
    %c0_i32_1 = arith.constant 0 : i32
    return %c0_i32, %c0_i32_0 : i32, i32
  }
  func.func @transform_6(%arg0: i32) -> (i32, i32) {
    %c0_i32 = arith.constant 0 : i32
    %c0_i32_0 = arith.constant 0 : i32
    %c0_i32_1 = arith.constant 0 : i32
    return %c0_i32, %c0_i32_0 : i32, i32
  }
  func.func @transform_7(%arg0: i32) -> (i32, i32) {
    %c0_i32 = arith.constant 0 : i32
    %c0_i32_0 = arith.constant 0 : i32
    %c0_i32_1 = arith.constant 0 : i32
    return %c0_i32, %c0_i32_0 : i32, i32
  }
  func.func @transform_8(%arg0: i32) -> (i32, i32) {
    %c0_i32 = arith.constant 0 : i32
    %c0_i32_0 = arith.constant 0 : i32
    %c0_i32_1 = arith.constant 0 : i32
    return %c0_i32, %c0_i32_0 : i32, i32
  }
  func.func @transform_9(%arg0: i32) -> (i32, i32) {
    %c0_i32 = arith.constant 0 : i32
    %c0_i32_0 = arith.constant 0 : i32
    %c0_i32_1 = arith.constant 0 : i32
    return %c0_i32, %c0_i32_0 : i32, i32
  }
  func.func @transform_10(%arg0: i32) -> (i32, i32, i32) {
    %c0_i32 = arith.constant 0 : i32
    %c0_i32_0 = arith.constant 0 : i32
    %c0_i32_1 = arith.constant 0 : i32
    %c0_i32_2 = arith.constant 0 : i32
    return %c0_i32, %c0_i32_0, %c0_i32_1 : i32, i32, i32
  }
  func.func @transform_11(%arg0: i32) -> (i32, i32) {
    %c0_i32 = arith.constant 0 : i32
    %c0_i32_0 = arith.constant 0 : i32
    %c0_i32_1 = arith.constant 0 : i32
    return %c0_i32, %c0_i32_0 : i32, i32
  }
}

</mosaic_0001>

<bundles_post_ra>
// kernel: resnet50_basic_block.1
= control target key start
LH: loop header
LB: loop body
LE: loop exit
PB: predicated region body
PF: predicated region fallthrough
CT: control target
= control target key end

     0   :  { %v1880_v3 = vmov 0   ;;  %vm53_vm0 = vcmask 130048   ;;  %v1881_v44 = vmov 0.0|0.0   ;;  %s1882_s17 = smov 17   ;;  %s1883_s20 = smov 1   ;;  %vm223_vm1 = vcmask 138240   ;;  %s2493_s0 = inlined_call_operand.vmem [shape: f32[16,512], index: 0, kind: input, shape index: {}]   ;;  %s2494_s1 = inlined_call_operand.vmem [shape: f32[8,16], index: 1, kind: input, shape index: {}]   ;;  %s2495_s4 = inlined_call_operand.vmem [shape: f32[8,1], index: 4, kind: input, shape index: {}]   ;;  %s2496_s5 = inlined_call_operand.vmem [shape: f32[8,1], index: 5, kind: input, shape index: {}]   ;;  %s2497_s2 = inlined_call_operand.vmem [shape: f32[9,8,8], index: 2, kind: input, shape index: {}]   ;;  %s2498_s10 = inlined_call_operand.vmem [shape: f32[9,1,512], index: 10, kind: input, shape index: {}]   ;;  %s2499_s7 = inlined_call_operand.vmem [shape: f32[8,1], index: 7, kind: input, shape index: {}]   ;;  %s2500_s6 = inlined_call_operand.vmem [shape: f32[8,1], index: 6, kind: input, shape index: {}]   ;;  %s2501_s3 = inlined_call_operand.vmem [shape: f32[16,8], index: 3, kind: input, shape index: {}]   ;;  %s2502_s8 = inlined_call_operand.vmem [shape: f32[16,1], index: 8, kind: input, shape index: {}]   ;;  %s2503_s9 = inlined_call_operand.vmem [shape: f32[16,1], index: 9, kind: input, shape index: {}]   ;;  %s2504_s11 = inlined_call_operand.vmem [shape: f32[16,512], index: 11, kind: output, shape index: {}]  }
   0x1   :  { %v40_v0 = vld [vmem:[%s2493_s0 + $0x8] sm:$0xff]  ;;  %v42_v2 = vld [vmem:[%s2493_s0 + $0x18] sm:$0xff]  ;;  %89 = vmatprep.mubr.bf16.mxu0 %v1880_v3  ;;  %130 = vmatprep.mubr.bf16.mxu1 %v1880_v3  ;;  %v39_v6 = vld [vmem:[%s2493_s0] sm:$0xff]  ;;  %s1884_s21 = smov 16   ;;  %s1887_s22 = smov 127   ;;  %vm232_vm2 = vcmask 1043456  }
   0x2   :  { %v44_v1 = vld [vmem:[%s2493_s0 + $0x28] sm:$0xff]  ;;  %v46_v5 = vld [vmem:[%s2493_s0 + $0x38] sm:$0xff]  ;;  %v43_v7 = vld [vmem:[%s2493_s0 + $0x20] sm:$0xff]  ;;  %1862 = vset.pattern.permute.xlu1 %v1880_v3  ;;  %1863 = vset.pattern.permute.xlu0 %v1880_v3  ;;  %s1888_s23 = smov 112   ;;  %s1889_s24 = smov 111   ;;  %vm228_vm3 = vcmask 64512  }
   0x3   :  { %v50_v4 = vpack.c.bf16 %v44_v1, %v40_v0  ;;  %v52_v8 = vpack.c.bf16 %v46_v5, %v42_v2  ;;  %v49_v9 = vpack.c.bf16 %v43_v7, %v39_v6  ;;  %v41_v10 = vld [vmem:[%s2493_s0 + $0x10] sm:$0xff]  ;;  %v47_v12 = vld [vmem:[%s2494_s1] sm:$0xff]  ;;  %vm516_vm4 = vcmask 121856  }
   0x4   :  { %v45_v11 = vld [vmem:[%s2493_s0 + $0x30] sm:$0xff]  ;;  %v48_v14 = vpack.c.bf16 %v47_v12, %v47_v12  ;;  %v159_v42 = vld [vmem:[%s2495_s4] sm:$0xff]  ;;  %s1885_s4 = smov 15   ;;  %vm662_vm5 = vcmask 7168   ;;  %vm954_vm6 = vcmask 1039360   ;;  %vm1100_vm7 = vcmask 924672  }
   0x5   :  { %71 = vmatprep.subr.bf16.mxu0 %v50_v4  ;;  %v51_v13 = vpack.c.bf16 %v45_v11, %v41_v10  ;;  %112 = vmatprep.subr.bf16.mxu1 %v52_v8  ;;  %v172_v46 = vld [vmem:[%s2496_s5] sm:$0xff]  ;;  %s1886_s5 = smov 113   ;;  %vm1246_vm8 = vcmask 916480   ;;  %vm1392_vm9 = vcmask 908288  }
   0x6   :  { %72 = vmatpush1.bf16.msra.mxu0 %v49_v9  ;;  %v201_v9 = vld [vmem:[%s2497_s2] sm:$0xff] }
   0x7   :  { %113 = vmatpush1.bf16.msra.mxu1 %v51_v13 }
   0x9   :  { %1794 = vmatmul.mubr.msk.bf16.vlgmr.msra.gmra.mxu0 %vm53_vm0, %v48_v14 }
   0xa   :  { %1795 = vmatmul.mubr.msk.bf16.vlgmr.msra.gmra.mxu1 %vm53_vm0, %v48_v14  ;;  %277 = vmatprep.mubr.bf16.mxu0 %v1880_v3  ;;  %v202_v14 = vpack.c.bf16 %v201_v9, %v201_v9 }
   0xb   :  { %318 = vmatprep.mubr.bf16.mxu1 %v1880_v3 }
  0xc9   :  { %v91_v15 = vpop.f32.mrf.mxu0 }
  0xca   :  { %v132_v16 = vpop.f32.mrf.mxu1 }
  0xcb   :  { %v93_v17 = vpop.f32.mrf.mxu0 }
  0xcc   :  { %v139_v18 = vadd.f32 %v93_v17, %v91_v15  ;;  %v134_v19 = vpop.f32.mrf.mxu1 }
  0xcd   :  { %v95_v20 = vpop.f32.mrf.mxu0 }
  0xce   :  { %v136_v21 = vpop.f32.mrf.mxu1  ;;  %v140_v22 = vadd.f32 %v139_v18, %v132_v16 }
  0xcf   :  { %v96_v23 = vpop.f32.mrf.mxu0 }
  0xd0   :  { %v137_v24 = vpop.f32.mrf.mxu1  ;;  %v141_v25 = vadd.f32 %v140_v22, %v134_v19  ;;  %v1800_v22 = vld [vmem:[%s2497_s2 + $0x8] sm:$0xff] }
  0xd2   :  { %142 = vadd.xlane.f32.xlu0 %v141_v25 }
 0x15b   :  { %v143_v26 = vpop.xlane.xlu0 %142 }
 0x15c   :  { %v144_v27 = vmul.f32 0.001953125, %v143_v26 }
 0x15e   :  { %v145_v28 = vsub.f32 %v91_v15, %v144_v27  ;;  %v146_v29 = vsub.f32 %v93_v17, %v144_v27  ;;  %v147_v30 = vsub.f32 %v132_v16, %v144_v27  ;;  %v148_v31 = vsub.f32 %v134_v19, %v144_v27 }
 0x160   :  { %v149_v32 = vmul.f32 %v145_v28, %v145_v28  ;;  %v150_v33 = vmul.f32 %v146_v29, %v146_v29  ;;  %v151_v34 = vmul.f32 %v147_v30, %v147_v30  ;;  %v152_v36 = vmul.f32 %v148_v31, %v148_v31 }
 0x162   :  { %v153_v35 = vadd.f32 %v150_v33, %v149_v32 }
 0x164   :  { %v154_v37 = vadd.f32 %v153_v35, %v151_v34  ;;  %v1806_v35 = vld [vmem:[%s2497_s2 + $0x10] sm:$0xff] }
 0x166   :  { %v155_v38 = vadd.f32 %v154_v37, %v152_v36 }
 0x168   :  { %156 = vadd.xlane.f32.xlu0 %v155_v38 }
 0x17e   :  { %213 = vrot.lane.b32.xlu0 %v1881_v44, %s1882_s17 }
 0x182   :  { %652 = vrot.lane.b32.xlu0 %v1881_v44, %s1883_s20 }
 0x1f1   :  { %v157_v39 = vpop.xlane.xlu0 %156 }
 0x1f2   :  { %v158_v40 = vmul.f32 0.001953125, %v157_v39 }
 0x1f4   :  { %v160_v41 = vadd.f32 1e-05, %v158_v40  ;;  %v505_v40 = vpack.c.bf16 %v1806_v35, %v1806_v35 }
 0x1f5   :  { %v214_v2 = vpop.permute.xlu0 %213 }
 0x1f6   :  { %1864 = vrsqrt.f32 %v160_v41 }
 0x1f9   :  { %v2059_v5 = vpop.permute.xlu0 %652 }
 0x203   :  { %v1865_v43 = vpop.eup %1864 }
 0x204   :  { %v162_v45 = vmul.f32 %v1865_v43, %v159_v42 }
 0x206   :  { %165 = vperm.xlu1 %1862, %v162_v45  }
 0x20a   :  { %175 = vperm.xlu1 %1862, %v172_v46   ;;  %v1812_v46 = vld [vmem:[%s2497_s2 + $0x18] sm:$0xff] }
 0x20e   :  { %360 = vrot.lane.b32.xlu1 %v1881_v44, %s1884_s21 }
 0x212   :  { %506 = vrot.lane.b32.xlu1 %v1881_v44, %s1885_s4 }
 0x281   :  { %v166_v47 = vpop.permute.xlu1 %165 }
 0x282   :  { %v168_v48 = vmul.f32 %v166_v47, %v145_v28  ;;  %v169_v49 = vmul.f32 %v166_v47, %v146_v29  ;;  %v171_v50 = vmul.f32 %v166_v47, %v148_v31  ;;  %v170_v55 = vmul.f32 %v166_v47, %v147_v30 }
 0x283   :  { %v359_v28 = vpack.c.bf16 %v1800_v22, %v1800_v22 }
 0x285   :  { %v176_v51 = vpop.permute.xlu1 %175 }
 0x286   :  { %v178_v52 = vadd.f32 %v176_v51, %v168_v48  ;;  %v179_v53 = vadd.f32 %v176_v51, %v169_v49  ;;  %v181_v54 = vadd.f32 %v176_v51, %v171_v50  ;;  %v180_v58 = vadd.f32 %v176_v51, %v170_v55 }
 0x288   :  { %v182_v56 = vmax.f32 %v178_v52, 0.0  ;;  %v183_v57 = vmax.f32 %v179_v53, 0.0  ;;  %v185_v59 = vmax.f32 %v181_v54, 0.0  ;;  %v184_v62 = vmax.f32 %v180_v58, 0.0  ;;  %v1818_v58 = vld [vmem:[%s2497_s2 + $0x20] sm:$0xff] }
 0x289   :  { %v361_v1 = vpop.permute.xlu1 %360  ;;  %v651_v52 = vpack.c.bf16 %v1812_v46, %v1812_v46 }
 0x28a   :  { %v1999_v60 = vpack.c.bf16 %v182_v56, %v182_v56  ;;  %v2001_v61 = vpack.c.bf16 %v183_v57, %v183_v57  ;;  %v2007_v63 = vpack.c.bf16 %v185_v59, %v185_v59  ;;  %v2013_v0 = vpack.c.bf16 %v184_v62, %v184_v62 }
 0x28c   :  { %364 = vrot.lane.b32.xlu0 %v2001_v61, %s1884_s21  ;;  %215 = vrot.lane.b32.xlu1 %v1999_v60, %s1882_s17  ;;  %v802_v57 = vsel %vm232_vm2, %v1999_v60, 0  ;;  %v808_v62 = vsel %vm232_vm2, %v2013_v0, 0 }
 0x28d   :  { %v507_v4 = vpop.permute.xlu1 %506 }
 0x290   :  { %368 = vrot.lane.b32.xlu0 %v2007_v63, %s1884_s21  ;;  %217 = vrot.lane.b32.xlu1 %v2001_v61, %s1882_s17 }
 0x294   :  { %508 = vrot.lane.b32.xlu0 %v1999_v60, %s1885_s4  ;;  %219 = vrot.lane.b32.xlu1 %v2013_v0, %s1882_s17 }
 0x298   :  { %512 = vrot.lane.b32.xlu0 %v2013_v0, %s1885_s4  ;;  %221 = vrot.lane.b32.xlu1 %v2007_v63, %s1882_s17 }
 0x29c   :  { %656 = vrot.lane.b32.xlu0 %v2001_v61, %s1883_s20  ;;  %362 = vrot.lane.b32.xlu1 %v1999_v60, %s1884_s21 }
 0x2a0   :  { %660 = vrot.lane.b32.xlu0 %v2007_v63, %s1883_s20  ;;  %366 = vrot.lane.b32.xlu1 %v2013_v0, %s1884_s21 }
 0x2a4   :  { %1098 = vrot.lane.b32.xlu0 %v1881_v44, %s1886_s5  ;;  %510 = vrot.lane.b32.xlu1 %v2001_v61, %s1885_s4 }
 0x2a8   :  { %946 = vrot.lane.b32.xlu0 %v2001_v61, %s1887_s22  ;;  %514 = vrot.lane.b32.xlu1 %v2007_v63, %s1885_s4 }
 0x2ac   :  { %950 = vrot.lane.b32.xlu0 %v2007_v63, %s1887_s22  ;;  %654 = vrot.lane.b32.xlu1 %v1999_v60, %s1883_s20 }
 0x2b0   :  { %1090 = vrot.lane.b32.xlu0 %v1999_v60, %s1886_s5  ;;  %658 = vrot.lane.b32.xlu1 %v2013_v0, %s1883_s20 }
 0x2b4   :  { %1094 = vrot.lane.b32.xlu0 %v2013_v0, %s1886_s5  ;;  %952 = vrot.lane.b32.xlu1 %v1881_v44, %s1887_s22 }
 0x2b8   :  { %1238 = vrot.lane.b32.xlu0 %v2001_v61, %s1888_s23  ;;  %944 = vrot.lane.b32.xlu1 %v1999_v60, %s1887_s22 }
 0x2bc   :  { %1242 = vrot.lane.b32.xlu0 %v2007_v63, %s1888_s23  ;;  %948 = vrot.lane.b32.xlu1 %v2013_v0, %s1887_s22 }
 0x2c0   :  { %1382 = vrot.lane.b32.xlu0 %v1999_v60, %s1889_s24  ;;  %1092 = vrot.lane.b32.xlu1 %v2001_v61, %s1886_s5 }
 0x2c4   :  { %1386 = vrot.lane.b32.xlu0 %v2013_v0, %s1889_s24  ;;  %1096 = vrot.lane.b32.xlu1 %v2007_v63, %s1886_s5 }
 0x2c8   :  { %1236 = vrot.lane.b32.xlu1 %v1999_v60, %s1888_s23  ;;  %1390 = vrot.lane.b32.xlu0 %v1881_v44, %s1889_s24  ;;  %v797_v60 = vpack.c.bf16 %v1818_v58, %v1818_v58 }
 0x2cc   :  { %1240 = vrot.lane.b32.xlu1 %v2013_v0, %s1888_s23  ;;  %v1824_v0 = vld [vmem:[%s2497_s2 + $0x28] sm:$0xff] }
 0x2d0   :  { %1244 = vrot.lane.b32.xlu1 %v1881_v44, %s1888_s23 }
 0x2d4   :  { %1384 = vrot.lane.b32.xlu1 %v2001_v61, %s1889_s24 }
 0x2d8   :  { %1388 = vrot.lane.b32.xlu1 %v2007_v63, %s1889_s24 }
 0x2fe   :  { %v216_v6 = vpop.permute.xlu1 %215  ;;  %v365_v7 = vpop.permute.xlu0 %364 }
 0x2ff   :  { %v224_v8 = vsel %vm223_vm1, %v214_v2, %v216_v6 }
 0x300   :  { %v234_v13 = vsel %vm232_vm2, %v224_v8, 0 }
 0x302   :  { %v218_v10 = vpop.permute.xlu1 %217  ;;  %v369_v11 = vpop.permute.xlu0 %368 }
 0x303   :  { %v225_v12 = vsel %vm223_vm1, %v216_v6, %v218_v10 }
 0x304   :  { %1796 = vmatprep.subr.msk.bf16.mxu0 %vm232_vm2, %v225_v12 }
 0x305   :  { %260 = vmatpush1.bf16.msra.mxu0 %v234_v13 }
 0x306   :  { %v220_v15 = vpop.permute.xlu1 %219  ;;  %v509_v16 = vpop.permute.xlu0 %508 }
 0x307   :  { %v226_v17 = vsel %vm223_vm1, %v218_v10, %v220_v15  ;;  %v517_v34 = vsel %vm516_vm4, %v507_v4, %v509_v16  ;;  %v933_v10 = vpack.c.bf16 %v1824_v0, %v1824_v0 }
 0x308   :  { %1797 = vmatmul.mubr.msk.bf16.vlgmr.msra.gmra.mxu0 %vm228_vm3, %v202_v14  ;;  %v240_v21 = vsel %vm232_vm2, %v226_v17, 0  ;;  %v525_v39 = vsel %vm232_vm2, %v517_v34, 0 }
 0x309   :  { %422 = vmatprep.mubr.bf16.mxu0 %v1880_v3 }
 0x30a   :  { %v222_v18 = vpop.permute.xlu1 %221  ;;  %v513_v19 = vpop.permute.xlu0 %512 }
 0x30b   :  { %v227_v20 = vsel %vm223_vm1, %v220_v15, %v222_v18 }
 0x30c   :  { %1798 = vmatprep.subr.msk.bf16.mxu1 %vm232_vm2, %v227_v20 }
 0x30d   :  { %301 = vmatpush1.bf16.msra.mxu1 %v240_v21 }
 0x30e   :  { %v363_v23 = vpop.permute.xlu1 %362  ;;  %v657_v24 = vpop.permute.xlu0 %656 }
 0x30f   :  { %v371_v25 = vsel %vm53_vm0, %v361_v1, %v363_v23  ;;  %v372_v26 = vsel %vm53_vm0, %v363_v23, %v365_v7 }
 0x310   :  { %v379_v27 = vsel %vm232_vm2, %v371_v25, 0  ;;  %1799 = vmatmul.mubr.msk.bf16.vlgmr.msra.gmra.mxu1 %vm228_vm3, %v202_v14  ;;  %1801 = vmatprep.subr.msk.bf16.mxu0 %vm232_vm2, %v372_v26  ;;  %v1836_v25 = vld [vmem:[%s2497_s2 + $0x38] sm:$0xff] }
 0x311   :  { %405 = vmatpush1.bf16.msra.mxu0 %v379_v27  ;;  %463 = vmatprep.mubr.bf16.mxu1 %v1880_v3 }
 0x312   :  { %v367_v29 = vpop.permute.xlu1 %366  ;;  %v661_v30 = vpop.permute.xlu0 %660 }
 0x313   :  { %v373_v31 = vsel %vm53_vm0, %v365_v7, %v367_v29  ;;  %v374_v32 = vsel %vm53_vm0, %v367_v29, %v369_v11 }
 0x314   :  { %v385_v33 = vsel %vm232_vm2, %v373_v31, 0  ;;  %1802 = vmatmul.mubr.msk.bf16.vlgmr.msra.gmra.mxu0 %vm228_vm3, %v359_v28  ;;  %1803 = vmatprep.subr.msk.bf16.mxu1 %vm232_vm2, %v374_v32 }
 0x315   :  { %446 = vmatpush1.bf16.msra.mxu1 %v385_v33  ;;  %568 = vmatprep.mubr.bf16.mxu0 %v1880_v3 }
 0x316   :  { %v511_v36 = vpop.permute.xlu1 %510  ;;  %v2093_v37 = vpop.permute.xlu0 %1098 }
 0x317   :  { %v518_v38 = vsel %vm516_vm4, %v509_v16, %v511_v36  ;;  %v519_v41 = vsel %vm516_vm4, %v511_v36, %v513_v19  ;;  %v1830_v16 = vld [vmem:[%s2497_s2 + $0x30] sm:$0xff]  ;;  %v1842_v36 = vld [vmem:[%s2497_s2 + $0x40] sm:$0xff] }
 0x318   :  { %1804 = vmatmul.mubr.msk.bf16.vlgmr.msra.gmra.mxu1 %vm228_vm3, %v359_v28  ;;  %1807 = vmatprep.subr.msk.bf16.mxu0 %vm232_vm2, %v518_v38  ;;  %v531_v45 = vsel %vm232_vm2, %v519_v41, 0  ;;  %v1089_v22 = vpack.c.bf16 %v1830_v16, %v1830_v16 }
 0x319   :  { %551 = vmatpush1.bf16.msra.mxu0 %v525_v39  ;;  %609 = vmatprep.mubr.bf16.mxu1 %v1880_v3 }
 0x31a   :  { %v515_v42 = vpop.permute.xlu1 %514  ;;  %v947_v43 = vpop.permute.xlu0 %946 }
 0x31b   :  { %v520_v44 = vsel %vm516_vm4, %v513_v19, %v515_v42  ;;  %v1381_v42 = vpack.c.bf16 %v1842_v36, %v1842_v36 }
 0x31c   :  { %1808 = vmatmul.mubr.msk.bf16.vlgmr.msra.gmra.mxu0 %vm228_vm3, %v505_v40  ;;  %1809 = vmatprep.subr.msk.bf16.mxu1 %vm232_vm2, %v520_v44 }
 0x31d   :  { %592 = vmatpush1.bf16.msra.mxu1 %v531_v45  ;;  %714 = vmatprep.mubr.bf16.mxu0 %v1880_v3 }
 0x31e   :  { %v655_v47 = vpop.permute.xlu1 %654  ;;  %v951_v51 = vpop.permute.xlu0 %950 }
 0x31f   :  { %v663_v48 = vsel %vm662_vm5, %v2059_v5, %v655_v47  ;;  %v664_v49 = vsel %vm662_vm5, %v655_v47, %v657_v24 }
 0x320   :  { %v671_v50 = vsel %vm232_vm2, %v663_v48, 0  ;;  %1810 = vmatmul.mubr.msk.bf16.vlgmr.msra.gmra.mxu1 %vm228_vm3, %v505_v40  ;;  %1813 = vmatprep.subr.msk.bf16.mxu0 %vm232_vm2, %v664_v49 }
 0x321   :  { %697 = vmatpush1.bf16.msra.mxu0 %v671_v50  ;;  %755 = vmatprep.mubr.bf16.mxu1 %v1880_v3 }
 0x322   :  { %v659_v53 = vpop.permute.xlu1 %658  ;;  %1819 = vmatprep.subr.msk.bf16.mxu0 %vm232_vm2, %v2001_v61  ;;  %v1091_v59 = vpop.permute.xlu0 %1090 }
 0x323   :  { %v665_v54 = vsel %vm662_vm5, %v657_v24, %v659_v53  ;;  %v666_v55 = vsel %vm662_vm5, %v659_v53, %v661_v30  ;;  %v1235_v30 = vpack.c.bf16 %v1836_v25, %v1836_v25 }
 0x324   :  { %v677_v56 = vsel %vm232_vm2, %v665_v54, 0  ;;  %1814 = vmatmul.mubr.msk.bf16.vlgmr.msra.gmra.mxu0 %vm228_vm3, %v651_v52  ;;  %1815 = vmatprep.subr.msk.bf16.mxu1 %vm232_vm2, %v666_v55 }
 0x325   :  { %738 = vmatpush1.bf16.msra.mxu1 %v677_v56  ;;  %828 = vmatpush1.bf16.msra.mxu0 %v802_v57 }
 0x326   :  { %v953_v61 = vpop.permute.xlu1 %952  ;;  %1821 = vmatprep.subr.msk.bf16.mxu1 %vm232_vm2, %v2007_v63  ;;  %845 = vmatprep.mubr.bf16.mxu0 %v1880_v3  ;;  %v1095_v4 = vpop.permute.xlu0 %1094 }
 0x327   :  { %v958_v1 = vsel %vm954_vm6, %v951_v51, %v953_v61 }
 0x328   :  { %1816 = vmatmul.mubr.msk.bf16.vlgmr.msra.gmra.mxu1 %vm228_vm3, %v651_v52 }
 0x329   :  { %869 = vmatpush1.bf16.msra.mxu1 %v808_v62  ;;  %886 = vmatprep.mubr.bf16.mxu1 %v1880_v3 }
 0x32a   :  { %v945_v2 = vpop.permute.xlu1 %944  ;;  %1827 = vmatprep.subr.msk.bf16.mxu1 %vm232_vm2, %v958_v1  ;;  %v1239_v11 = vpop.permute.xlu0 %1238 }
 0x32b   :  { %v955_v63 = vsel %vm954_vm6, %v945_v2, %v947_v43 }
 0x32c   :  { %1820 = vmatmul.mubr.msk.bf16.vlgmr.msra.gmra.mxu0 %vm228_vm3, %v797_v60  ;;  %v963_v8 = vsel %vm232_vm2, %v955_v63, 0 }
 0x32d   :  { %1006 = vmatprep.mubr.bf16.mxu0 %v1880_v3 }
 0x32e   :  { %v949_v5 = vpop.permute.xlu1 %948  ;;  %v1243_v20 = vpop.permute.xlu0 %1242 }
 0x32f   :  { %v956_v6 = vsel %vm954_vm6, %v947_v43, %v949_v5  ;;  %v957_v7 = vsel %vm954_vm6, %v949_v5, %v951_v51 }
 0x330   :  { %v969_v9 = vsel %vm232_vm2, %v957_v7, 0  ;;  %1822 = vmatmul.mubr.msk.bf16.vlgmr.msra.gmra.mxu1 %vm228_vm3, %v797_v60  ;;  %1825 = vmatprep.subr.msk.bf16.mxu0 %vm232_vm2, %v956_v6 }
 0x331   :  { %989 = vmatpush1.bf16.msra.mxu0 %v963_v8  ;;  %1030 = vmatpush1.bf16.msra.mxu1 %v969_v9 }
 0x332   :  { %v1093_v12 = vpop.permute.xlu1 %1092  ;;  %1047 = vmatprep.mubr.bf16.mxu1 %v1880_v3  ;;  %v1383_v26 = vpop.permute.xlu0 %1382 }
 0x333   :  { %v1101_v13 = vsel %vm1100_vm7, %v1091_v59, %v1093_v12  ;;  %v1102_v14 = vsel %vm1100_vm7, %v1093_v12, %v1095_v4 }
 0x334   :  { %v1109_v15 = vsel %vm232_vm2, %v1101_v13, 0  ;;  %1826 = vmatmul.mubr.msk.bf16.vlgmr.msra.gmra.mxu0 %vm228_vm3, %v933_v10  ;;  %1831 = vmatprep.subr.msk.bf16.mxu0 %vm232_vm2, %v1102_v14  ;;  %v329_v13 = vlaneseq }
 0x335   :  { %1135 = vmatpush1.bf16.msra.mxu0 %v1109_v15  ;;  %1152 = vmatprep.mubr.bf16.mxu0 %v1880_v3 }
 0x336   :  { %v1097_v17 = vpop.permute.xlu1 %1096  ;;  %v1387_v34 = vpop.permute.xlu0 %1386 }
 0x337   :  { %v1103_v18 = vsel %vm1100_vm7, %v1095_v4, %v1097_v17  ;;  %v1104_v19 = vsel %vm1100_vm7, %v1097_v17, %v2093_v37 }
 0x338   :  { %v1115_v21 = vsel %vm232_vm2, %v1103_v18, 0  ;;  %1828 = vmatmul.mubr.msk.bf16.vlgmr.msra.gmra.mxu1 %vm228_vm3, %v933_v10  ;;  %1833 = vmatprep.subr.msk.bf16.mxu1 %vm232_vm2, %v1104_v19  ;;  %v330_v18 = vshrl.u32 %v329_v13, 7 }
 0x339   :  { %1176 = vmatpush1.bf16.msra.mxu1 %v1115_v21  ;;  %1193 = vmatprep.mubr.bf16.mxu1 %v1880_v3 }
 0x33a   :  { %v1237_v23 = vpop.permute.xlu1 %1236  ;;  %v1391_v41 = vpop.permute.xlu0 %1390  ;;  %v2244_v25 = vsub.s32 2, %v330_v18 }
 0x33b   :  { %v1247_v24 = vsel %vm1246_vm8, %v1237_v23, %v1239_v11  ;;  %v2240_v23 = vsub.s32 0, %v330_v18 }
 0x33c   :  { %1832 = vmatmul.mubr.msk.bf16.vlgmr.msra.gmra.mxu0 %vm228_vm3, %v1089_v22  ;;  %v1255_v29 = vsel %vm232_vm2, %v1247_v24, 0  ;;  %v2242_v24 = vsub.s32 1, %v330_v18  ;;  %2512 = vst [vmem:[#allocation5_spill] sm:$0xff] %v2244_v25 }
 0x33d   :  { %1298 = vmatprep.mubr.bf16.mxu0 %v1880_v3  ;;  %2511 = vst [vmem:[#allocation4_spill] sm:$0xff] %v2240_v23 }
 0x33e   :  { %v1241_v27 = vpop.permute.xlu1 %1240 }
 0x33f   :  { %v1248_v28 = vsel %vm1246_vm8, %v1239_v11, %v1241_v27  ;;  %v1249_v31 = vsel %vm1246_vm8, %v1241_v27, %v1243_v20 }
 0x340   :  { %1834 = vmatmul.mubr.msk.bf16.vlgmr.msra.gmra.mxu1 %vm228_vm3, %v1089_v22  ;;  %1837 = vmatprep.subr.msk.bf16.mxu0 %vm232_vm2, %v1248_v28  ;;  %v1261_v35 = vsel %vm232_vm2, %v1249_v31, 0 }
 0x341   :  { %1281 = vmatpush1.bf16.msra.mxu0 %v1255_v29  ;;  %1339 = vmatprep.mubr.bf16.mxu1 %v1880_v3  ;;  %v2253_v29 = vld [vmem:[%s2498_s10] sm:$0xf] }
 0x342   :  { %v1245_v32 = vpop.permute.xlu1 %1244  ;;  %v340_v36 = vrot.slane %v2253_v29, %v2244_v25 }
 0x343   :  { %v1250_v33 = vsel %vm1246_vm8, %v1243_v20, %v1245_v32 }
 0x344   :  { %1838 = vmatmul.mubr.msk.bf16.vlgmr.msra.gmra.mxu0 %vm228_vm3, %v1235_v30  ;;  %1839 = vmatprep.subr.msk.bf16.mxu1 %vm232_vm2, %v1250_v33  ;;  %v2263_v33 = vld [vmem:[%s2498_s10 + $0x8] sm:$0xf] }
 0x345   :  { %1322 = vmatpush1.bf16.msra.mxu1 %v1261_v35  ;;  %1444 = vmatprep.mubr.bf16.mxu0 %v1880_v3  ;;  %v336_v35 = vrot.slane %v2253_v29, %v2242_v24 }
 0x346   :  { %v1385_v37 = vpop.permute.xlu1 %1384 }
 0x347   :  { %v1393_v38 = vsel %vm1392_vm9, %v1383_v26, %v1385_v37  ;;  %v1394_v39 = vsel %vm1392_vm9, %v1385_v37, %v1387_v34  ;;  %v2246_v26 = vsub.s32 3, %v330_v18  ;;  %v2330_v18 = vld [vmem:[%s2498_s10 + $0x1c] sm:$0xf] }
 0x348   :  { %v1401_v40 = vsel %vm232_vm2, %v1393_v38, 0  ;;  %1840 = vmatmul.mubr.msk.bf16.vlgmr.msra.gmra.mxu1 %vm228_vm3, %v1235_v30  ;;  %1843 = vmatprep.subr.msk.bf16.mxu0 %vm232_vm2, %v1394_v39  ;;  %v1805_v30 = vld [vmem:[%s2498_s10 + $0x4] sm:$0xf]  ;;  %v2276_v38 = vld [vmem:[%s2498_s10 + $0xc] sm:$0xf] }
 0x349   :  { %1427 = vmatpush1.bf16.msra.mxu0 %v1401_v40  ;;  %1485 = vmatprep.mubr.bf16.mxu1 %v1880_v3 }
 0x34a   :  { %v1389_v43 = vpop.permute.xlu1 %1388 }
 0x34b   :  { %v1395_v44 = vsel %vm1392_vm9, %v1387_v34, %v1389_v43  ;;  %v1396_v45 = vsel %vm1392_vm9, %v1389_v43, %v1391_v41  ;;  %v332_v34 = vrot.slane %v2253_v29, %v2240_v23  ;;  %v478_v41 = vrot.slane %v1805_v30, %v2240_v23 }
 0x34c   :  { %v1407_v46 = vsel %vm232_vm2, %v1395_v44, 0  ;;  %1844 = vmatmul.mubr.msk.bf16.vlgmr.msra.gmra.mxu0 %vm228_vm3, %v1381_v42  ;;  %1845 = vmatprep.subr.msk.bf16.mxu1 %vm232_vm2, %v1396_v45  ;;  %v486_v43 = vrot.slane %v1805_v30, %v2244_v25  ;;  %v490_v44 = vrot.slane %v1805_v30, %v2246_v26  ;;  %v2287_v45 = vld [vmem:[%s2498_s10 + $0x10] sm:$0xf] }
 0x34d   :  { %1468 = vmatpush1.bf16.msra.mxu1 %v1407_v46  ;;  %1626 = vmatprep.mubr.bf16.mxu0 %v1880_v3  ;;  %v624_v46 = vrot.slane %v2263_v33, %v2240_v23  ;;  %v913_v13 = vrot.slane %v2287_v45, %v2246_v26 }
 0x350   :  { %1846 = vmatmul.mubr.msk.bf16.vlgmr.msra.gmra.mxu1 %vm228_vm3, %v1381_v42  ;;  %v482_v42 = vrot.slane %v1805_v30, %v2242_v24 }
 0x351   :  { %1669 = vmatprep.mubr.bf16.mxu1 %v1880_v3 }
 0x3c8   :  { %v2200_v47 = vpop.f32.mrf.mxu0 }
 0x3ca   :  { %v2202_v48 = vpop.f32.mrf.mxu0 }
 0x3cc   :  { %v283_v49 = vpop.f32.mrf.mxu0 }
 0x3cd   :  { %v628_v49 = vrot.slane %v2263_v33, %v2242_v24 }
 0x3ce   :  { %v284_v50 = vpop.f32.mrf.mxu0 }
 0x3cf   :  { %v632_v50 = vrot.slane %v2263_v33, %v2244_v25 }
 0x3d0   :  { %v2204_v51 = vpop.f32.mrf.mxu1 }
 0x3d2   :  { %v2206_v52 = vpop.f32.mrf.mxu1 }
 0x3d4   :  { %v324_v53 = vpop.f32.mrf.mxu1  ;;  %v2208_v54 = vpop.f32.mrf.mxu0 }
 0x3d5   :  { %v636_v53 = vrot.slane %v2263_v33, %v2246_v26  ;;  %v495_v30 = vmul.f32 %v478_v41, %v2208_v54  ;;  %v350_v41 = vmul.f32 %v336_v35, %v2202_v48 }
 0x3d6   :  { %v325_v55 = vpop.f32.mrf.mxu1  ;;  %v2210_v56 = vpop.f32.mrf.mxu0 }
 0x3d7   :  { %v2300_v55 = vld [vmem:[%s2498_s10 + $0x14] sm:$0xf]  ;;  %v496_v37 = vmul.f32 %v482_v42, %v2210_v56  ;;  %v349_v56 = vmul.f32 %v332_v34, %v2200_v47 }
 0x3d8   :  { %v428_v57 = vpop.f32.mrf.mxu0  ;;  %v2212_v58 = vpop.f32.mrf.mxu1  ;;  %2514 = vst [vmem:[#allocation7_spill] sm:$0xff] %v2300_v55 }
 0x3d9   :  { %v499_v54 = vadd.f32 %v495_v30, %v349_v56 }
 0x3da   :  { %v429_v3 = vpop.f32.mrf.mxu0  ;;  %v2214_v59 = vpop.f32.mrf.mxu1 }
 0x3dc   :  { %v469_v61 = vpop.f32.mrf.mxu1  ;;  %v2216_v62 = vpop.f32.mrf.mxu0 }
 0x3dd   :  { %v770_v61 = vrot.slane %v2276_v38, %v2240_v23  ;;  %v641_v42 = vmul.f32 %v624_v46, %v2216_v62  ;;  %v2518_v62 = vrot.slane %v2253_v29, %v2246_v26 }
 0x3de   :  { %v470_v60 = vpop.f32.mrf.mxu1  ;;  %v2218_v1 = vpop.f32.mrf.mxu0 }
 0x3df   :  { %v774_v60 = vrot.slane %v2276_v38, %v2242_v24  ;;  %v645_v35 = vadd.f32 %v641_v42, %v499_v54  ;;  %v2523_v56 = vld [vmem:[#allocation7_spill] sm:$0xff] }
 0x3e0   :  { %v574_v2 = vpop.f32.mrf.mxu0  ;;  %v2220_v4 = vpop.f32.mrf.mxu1 }
 0x3e1   :  { %v778_v2 = vrot.slane %v2276_v38, %v2244_v25 }
 0x3e2   :  { %v575_v63 = vpop.f32.mrf.mxu0  ;;  %v2222_v0 = vpop.f32.mrf.mxu1 }
 0x3e3   :  { %v782_v63 = vrot.slane %v2276_v38, %v2246_v26 }
 0x3e4   :  { %v615_v5 = vpop.f32.mrf.mxu1  ;;  %v2224_v6 = vpop.f32.mrf.mxu0 }
 0x3e5   :  { %v2315_v5 = vld [vmem:[%s2498_s10 + $0x18] sm:$0xf]  ;;  %v787_v47 = vmul.f32 %v770_v61, %v2224_v6 }
 0x3e6   :  { %v616_v7 = vpop.f32.mrf.mxu1  ;;  %v2226_v8 = vpop.f32.mrf.mxu0  ;;  %2516 = vst [vmem:[#allocation9_spill] sm:$0xff] %v2315_v5  ;;  %v1208_v33 = vrot.slane %v2315_v5, %v2240_v23 }
 0x3e7   :  { %v901_v7 = vrot.slane %v2287_v45, %v2240_v23  ;;  %v788_v48 = vmul.f32 %v774_v60, %v2226_v8 }
 0x3e8   :  { %v720_v9 = vpop.f32.mrf.mxu0  ;;  %v2228_v10 = vpop.f32.mrf.mxu1 }
 0x3e9   :  { %v905_v9 = vrot.slane %v2287_v45, %v2242_v24 }
 0x3ea   :  { %v721_v11 = vpop.f32.mrf.mxu0  ;;  %v2230_v12 = vpop.f32.mrf.mxu1 }
 0x3eb   :  { %v909_v11 = vrot.slane %v2287_v45, %v2244_v25  ;;  %v1212_v45 = vrot.slane %v2315_v5, %v2242_v24  ;;  %v790_v46 = vmul.f32 %v782_v63, %v2230_v12 }
 0x3ec   :  { %v761_v14 = vpop.f32.mrf.mxu1  ;;  %v2232_v15 = vpop.f32.mrf.mxu0 }
 0x3ee   :  { %v762_v16 = vpop.f32.mrf.mxu1  ;;  %v2234_v17 = vpop.f32.mrf.mxu0 }
 0x3ef   :  { %v919_v6 = vmul.f32 %v905_v9, %v2234_v17 }
 0x3f0   :  { %v851_v19 = vpop.f32.mrf.mxu0  ;;  %v2236_v20 = vpop.f32.mrf.mxu1 }
 0x3f1   :  { %v1062_v19 = vrot.slane %v2300_v55, %v2240_v23  ;;  %v920_v29 = vmul.f32 %v909_v11, %v2236_v20 }
 0x3f2   :  { %v852_v21 = vpop.f32.mrf.mxu0  ;;  %v2238_v22 = vpop.f32.mrf.mxu1 }
 0x3f3   :  { %2510 = vst [vmem:[#allocation3_spill] sm:$0xff] %v2238_v22  ;;  %v1066_v21 = vrot.slane %v2300_v55, %v2242_v24 }
 0x3f4   :  { %v892_v27 = vpop.f32.mrf.mxu1  ;;  %v2248_v28 = vpop.f32.mrf.mxu0 }
 0x3f5   :  { %v1070_v27 = vrot.slane %v2300_v55, %v2244_v25  ;;  %v1354_v55 = vrot.slane %v2330_v18, %v2240_v23  ;;  %v500_v23 = vadd.f32 %v496_v37, %v350_v41  ;;  %v918_v37 = vmul.f32 %v901_v7, %v2232_v15 }
 0x3f6   :  { %v893_v31 = vpop.f32.mrf.mxu1  ;;  %v2258_v32 = vpop.f32.mrf.mxu0 }
 0x3f7   :  { %v2343_v31 = vld [vmem:[%s2498_s10 + $0x20] sm:$0xf] }
 0x3f8   :  { %v1012_v39 = vpop.f32.mrf.mxu0  ;;  %v2278_v40 = vpop.f32.mrf.mxu1 }
 0x3f9   :  { %2513 = vst [vmem:[#allocation6_spill] sm:$0xff] %v2278_v40 }
 0x3fa   :  { %v1013_v57 = vpop.f32.mrf.mxu0  ;;  %v2302_v3 = vpop.f32.mrf.mxu1  ;;  %v2519_v61 = vld [vmem:[#allocation3_spill] sm:$0xff] }
 0x3fb   :  { %2515 = vst [vmem:[#allocation8_spill] sm:$0xff] %v2302_v3  ;;  %v1216_v57 = vrot.slane %v2315_v5, %v2244_v25  ;;  %v497_v3 = vmul.f32 %v486_v43, %v2212_v58  ;;  %v642_v5 = vmul.f32 %v628_v49, %v2218_v1  ;;  %v351_v58 = vmul.f32 %v340_v36, %v2204_v51 }
 0x3fc   :  { %v1053_v14 = vpop.f32.mrf.mxu1  ;;  %v2325_v16 = vpop.f32.mrf.mxu0  ;;  %v498_v43 = vmul.f32 %v490_v44, %v2214_v59  ;;  %v352_v51 = vmul.f32 %v2518_v62, %v2206_v52  ;;  %v644_v59 = vmul.f32 %v636_v53, %v2222_v0  ;;  %v1080_v53 = vmul.f32 %v1066_v21, %v2258_v32  ;;  %v2527_v62 = vld [vmem:[#allocation5_spill] sm:$0xff] }
 0x3fd   :  { %2517 = vst [vmem:[#allocation10_spill] sm:$0xff] %v2325_v16  ;;  %v1504_v14 = vrot.slane %v2343_v31, %v2242_v24  ;;  %v501_v1 = vadd.f32 %v497_v3, %v351_v58  ;;  %v646_v36 = vadd.f32 %v642_v5, %v500_v23  ;;  %v921_v15 = vmul.f32 %v913_v13, %v2519_v61 }
 0x3fe   :  { %v1054_v38 = vpop.f32.mrf.mxu1  ;;  %v1156_v39 = vpop.f32.mrf.mxu0  ;;  %v502_v44 = vadd.f32 %v498_v43, %v352_v51  ;;  %v1508_v51 = vrot.slane %v2343_v31, %v2527_v62 }
 0x3ff   :  { %v1358_v38 = vrot.slane %v2330_v18, %v2242_v24  ;;  %v792_v0 = vadd.f32 %v788_v48, %v646_v36  ;;  %v1226_v9 = vmul.f32 %v1212_v45, %v1156_v39  ;;  %v1558_v24 = vld [vmem:[%s2499_s7] sm:$0xff] }
 0x400   :  { %v1158_v16 = vpop.f32.mrf.mxu0  ;;  %v1195_v40 = vpop.f32.mrf.mxu1  ;;  %v648_v3 = vadd.f32 %v644_v59, %v502_v44  ;;  %v2520_v60 = vld [vmem:[#allocation6_spill] sm:$0xff]  ;;  %v2531_v44 = vrot.slane %v2330_v18, %v2246_v26 }
 0x401   :  { %v643_v16 = vmul.f32 %v632_v50, %v2220_v4  ;;  %v789_v4 = vmul.f32 %v778_v2, %v2228_v10  ;;  %v791_v50 = vadd.f32 %v787_v47, %v645_v35  ;;  %v1079_v10 = vmul.f32 %v1062_v19, %v2248_v28  ;;  %v2525_v47 = vld [vmem:[#allocation9_spill] sm:$0xff] }
 0x402   :  { %v1159_v22 = vpop.f32.mrf.mxu0  ;;  %v1197_v25 = vpop.f32.mrf.mxu1  ;;  %v1081_v17 = vmul.f32 %v1070_v27, %v2520_v60  ;;  %v923_v12 = vadd.f32 %v919_v6, %v792_v0  ;;  %v794_v11 = vadd.f32 %v790_v46, %v648_v3  ;;  %v2522_v54 = vld [vmem:[#allocation8_spill] sm:$0xff]  ;;  %v2524_v28 = vrot.slane %v2523_v56, %v2246_v26 }
 0x403   :  { %v647_v8 = vadd.f32 %v643_v16, %v501_v1  ;;  %v922_v7 = vadd.f32 %v918_v37, %v791_v50  ;;  %v1227_v19 = vmul.f32 %v1216_v57, %v1195_v40  ;;  %v2528_v40 = vrot.slane %v2330_v18, %v2527_v62 }
 0x404   :  { %v1199_v22 = vpop.f32.mrf.mxu1  ;;  %v1300_v34 = vpop.f32.mrf.mxu0  ;;  %v2521_v63 = vld [vmem:[#allocation10_spill] sm:$0xff]  ;;  %v1082_v32 = vmul.f32 %v2524_v28, %v2522_v54  ;;  %v1084_v42 = vadd.f32 %v1080_v53, %v923_v12  ;;  %v925_v43 = vadd.f32 %v921_v15, %v794_v11 }
 0x405   :  { %v793_v23 = vadd.f32 %v789_v4, %v647_v8  ;;  %v1225_v20 = vmul.f32 %v1208_v33, %v2521_v63  ;;  %v1083_v13 = vadd.f32 %v1079_v10, %v922_v7  ;;  %v1371_v27 = vmul.f32 %v1354_v55, %v1300_v34  ;;  %v2529_v55 = vld [vmem:[#allocation4_spill] sm:$0xff] }
 0x406   :  { %v1200_v52 = vpop.f32.mrf.mxu1  ;;  %v1302_v49 = vpop.f32.mrf.mxu0  ;;  %v2526_v33 = vrot.slane %v2525_v47, %v2246_v26  ;;  %v1230_v59 = vadd.f32 %v1226_v9, %v1084_v42  ;;  %v1086_v22 = vadd.f32 %v1082_v32, %v925_v43  ;;  %v1545_v42 = vld [vmem:[%s2500_s6] sm:$0xff] }
 0x407   :  { %v924_v30 = vadd.f32 %v920_v29, %v793_v23  ;;  %v1372_v58 = vmul.f32 %v1358_v38, %v1302_v49  ;;  %v1229_v1 = vadd.f32 %v1225_v20, %v1083_v13  ;;  %v2530_v38 = vrot.slane %v2343_v31, %v2529_v55 }
 0x408   :  { %v1304_v2 = vpop.f32.mrf.mxu0  ;;  %v1341_v5 = vpop.f32.mrf.mxu1  ;;  %v1228_v39 = vmul.f32 %v2526_v33, %v1197_v25  ;;  %v1512_v25 = vrot.slane %v2343_v31, %v2246_v26 }
 0x409   :  { %v1085_v16 = vadd.f32 %v1081_v17, %v924_v30  ;;  %v1373_v57 = vmul.f32 %v2528_v40, %v1341_v5  ;;  %v1375_v37 = vadd.f32 %v1371_v27, %v1229_v1  ;;  %v1376_v6 = vadd.f32 %v1372_v58, %v1230_v59 }
 0x40a   :  { %v1305_v21 = vpop.f32.mrf.mxu0  ;;  %v1343_v41 = vpop.f32.mrf.mxu1  ;;  %v1232_v29 = vadd.f32 %v1228_v39, %v1086_v22 }
 0x40b   :  { %v1231_v34 = vadd.f32 %v1227_v19, %v1085_v16  ;;  %v1374_v8 = vmul.f32 %v2531_v44, %v1343_v41 }
 0x40c   :  { %v1345_v45 = vpop.f32.mrf.mxu1  ;;  %v1446_v48 = vpop.f32.mrf.mxu0 }
 0x40d   :  { %v1517_v4 = vmul.f32 %v2530_v38, %v1446_v48  ;;  %v1377_v50 = vadd.f32 %v1373_v57, %v1231_v34  ;;  %v1378_v61 = vadd.f32 %v1374_v8, %v1232_v29  ;;  %v1572_v38 = vld [vmem:[%s2501_s3] sm:$0xff] }
 0x40e   :  { %v1346_v35 = vpop.f32.mrf.mxu1  ;;  %v1448_v36 = vpop.f32.mrf.mxu0 }
 0x40f   :  { %v1518_v46 = vmul.f32 %v1504_v14, %v1448_v36  ;;  %v1521_v0 = vadd.f32 %v1517_v4, %v1375_v37  ;;  %v1573_v4 = vld [vmem:[%s2501_s3 + $0x8] sm:$0xff] }
 0x410   :  { %v1450_v52 = vpop.f32.mrf.mxu0  ;;  %v1487_v49 = vpop.f32.mrf.mxu1 }
 0x411   :  { %v1522_v10 = vadd.f32 %v1518_v46, %v1376_v6  ;;  %v1519_v53 = vmul.f32 %v1508_v51, %v1487_v49  ;;  %v1574_v6 = vpack.c.bf16 %v1573_v4, %v1572_v38 }
 0x412   :  { %v1451_v3 = vpop.f32.mrf.mxu0  ;;  %v1489_v23 = vpop.f32.mrf.mxu1 }
 0x413   :  { %v1525_v15 = vadd.f32 %v1522_v10, %v1521_v0  ;;  %v1523_v60 = vadd.f32 %v1519_v53, %v1377_v50  ;;  %v1520_v17 = vmul.f32 %v1512_v25, %v1489_v23 }
 0x414   :  { %v1491_v2 = vpop.f32.mrf.mxu1 }
 0x415   :  { %v1524_v26 = vadd.f32 %v1520_v17, %v1378_v61  ;;  %v1526_v18 = vadd.f32 %v1525_v15, %v1523_v60 }
 0x416   :  { %v1492_v5 = vpop.f32.mrf.mxu1 }
 0x417   :  { %v1527_v7 = vadd.f32 %v1526_v18, %v1524_v26 }
 0x419   :  { %1528 = vadd.xlane.f32.xlu1 %v1527_v7 }
 0x42a   :  { %1561 = vperm.xlu1 %1862, %v1558_v24  }
 0x4a2   :  { %v1529_v31 = vpop.xlane.xlu1 %1528 }
 0x4a3   :  { %v1530_v14 = vmul.f32 0.001953125, %v1529_v31 }
 0x4a5   :  { %v1531_v12 = vsub.f32 %v1521_v0, %v1530_v14  ;;  %v1532_v63 = vsub.f32 %v1522_v10, %v1530_v14  ;;  %v1533_v20 = vsub.f32 %v1523_v60, %v1530_v14  ;;  %v1534_v9 = vsub.f32 %v1524_v26, %v1530_v14 }
 0x4a6   :  { %v1562_v45 = vpop.permute.xlu1 %1561 }
 0x4a7   :  { %v1535_v11 = vmul.f32 %v1531_v12, %v1531_v12  ;;  %v1536_v30 = vmul.f32 %v1532_v63, %v1532_v63  ;;  %v1537_v54 = vmul.f32 %v1533_v20, %v1533_v20  ;;  %v1538_v28 = vmul.f32 %v1534_v9, %v1534_v9 }
 0x4a9   :  { %v1539_v56 = vadd.f32 %v1536_v30, %v1535_v11 }
 0x4ab   :  { %v1540_v32 = vadd.f32 %v1539_v56, %v1537_v54 }
 0x4ad   :  { %v1541_v19 = vadd.f32 %v1540_v32, %v1538_v28 }
 0x4af   :  { %1542 = vadd.xlane.f32.xlu0 %v1541_v19 }
 0x538   :  { %v1543_v21 = vpop.xlane.xlu0 %1542 }
 0x539   :  { %v1544_v41 = vmul.f32 0.001953125, %v1543_v21 }
 0x53b   :  { %v1546_v13 = vadd.f32 1e-05, %v1544_v41 }
 0x53d   :  { %1866 = vrsqrt.f32 %v1546_v13 }
 0x54a   :  { %v1867_v27 = vpop.eup %1866 }
 0x54b   :  { %v1548_v58 = vmul.f32 %v1867_v27, %v1545_v42 }
 0x54d   :  { %1551 = vperm.xlu0 %1863, %v1548_v58  }
 0x5c8   :  { %v1552_v43 = vpop.permute.xlu0 %1551 }
 0x5c9   :  { %v1554_v16 = vmul.f32 %v1552_v43, %v1531_v12  ;;  %v1555_v47 = vmul.f32 %v1552_v43, %v1532_v63  ;;  %v1556_v33 = vmul.f32 %v1552_v43, %v1533_v20  ;;  %v1557_v39 = vmul.f32 %v1552_v43, %v1534_v9 }
 0x5cb   :  { %v1565_v48 = vadd.f32 %v1562_v45, %v1555_v47  ;;  %v1567_v62 = vadd.f32 %v1562_v45, %v1557_v39  ;;  %v1564_v51 = vadd.f32 %v1562_v45, %v1554_v16  ;;  %v1566_v1 = vadd.f32 %v1562_v45, %v1556_v33  ;;  %v1720_v45 = vld [vmem:[%s2502_s8] sm:$0xff] }
 0x5cd   :  { %v1569_v59 = vmax.f32 %v1565_v48, 0.0  ;;  %v1571_v40 = vmax.f32 %v1567_v62, 0.0  ;;  %v1568_v57 = vmax.f32 %v1564_v51, 0.0  ;;  %v1570_v55 = vmax.f32 %v1566_v1, 0.0  ;;  %v1721_v51 = vld [vmem:[%s2502_s8 + $0x8] sm:$0xff] }
 0x5cf   :  { %v1576_v22 = vpack.c.bf16 %v1569_v59, %v1569_v59  ;;  %v1578_v34 = vpack.c.bf16 %v1571_v40, %v1571_v40  ;;  %v1575_v35 = vpack.c.bf16 %v1568_v57, %v1568_v57  ;;  %v1577_v36 = vpack.c.bf16 %v1570_v55, %v1570_v55  ;;  %v1746_v59 = vld [vmem:[%s2503_s9] sm:$0xff]  ;;  %v1747_v57 = vld [vmem:[%s2503_s9 + $0x8] sm:$0xff] }
 0x5d1   :  { %1848 = vmatprep.subr.msk.bf16.mxu0 %vm232_vm2, %v1576_v22  ;;  %1850 = vmatprep.subr.msk.bf16.mxu1 %vm232_vm2, %v1578_v34  ;;  %v1583_v25 = vsel %vm232_vm2, %v1575_v35, 0  ;;  %v1589_v37 = vsel %vm232_vm2, %v1577_v36, 0 }
 0x5d2   :  { %1609 = vmatpush1.bf16.msra.mxu0 %v1583_v25  ;;  %1652 = vmatpush1.bf16.msra.mxu1 %v1589_v37 }
 0x5d5   :  { %1849 = vmatmul.mubr.msk.bf16.vlgmr.msra.gmra.mxu0 %vm228_vm3, %v1574_v6  ;;  %1851 = vmatmul.mubr.msk.bf16.vlgmr.msra.gmra.mxu1 %vm228_vm3, %v1574_v6 }
 0x695   :  { %v1628_v44 = vpop.f32.mrf.mxu0  ;;  %v1671_v8 = vpop.f32.mrf.mxu1 }
 0x697   :  { %v1630_v46 = vpop.f32.mrf.mxu0  ;;  %v1673_v29 = vpop.f32.mrf.mxu1 }
 0x698   :  { %v1680_v52 = vadd.f32 %v1630_v46, %v1628_v44 }
 0x699   :  { %v1632_v49 = vpop.f32.mrf.mxu0  ;;  %v1675_v10 = vpop.f32.mrf.mxu1 }
 0x69a   :  { %v1681_v50 = vadd.f32 %v1680_v52, %v1671_v8 }
 0x69b   :  { %v1634_v0 = vpop.f32.mrf.mxu0  ;;  %v1677_v61 = vpop.f32.mrf.mxu1 }
 0x69c   :  { %v1685_v53 = vadd.f32 %v1634_v0, %v1632_v49  ;;  %v1682_v3 = vadd.f32 %v1681_v50, %v1673_v29 }
 0x69e   :  { %v1686_v23 = vadd.f32 %v1685_v53, %v1675_v10  ;;  %1683 = vadd.xlane.f32.xlu1 %v1682_v3  ;;  %v1874_v53 = vld [vmem:[%s2493_s0 + $0x10] sm:$0xff] }
 0x6a0   :  { %v1687_v15 = vadd.f32 %v1686_v23, %v1677_v61  ;;  %v1875_v23 = vld [vmem:[%s2493_s0 + $0x18] sm:$0xff] }
 0x6a2   :  { %1688 = vadd.xlane.f32.xlu0 %v1687_v15 }
 0x727   :  { %v1684_v60 = vpop.xlane.xlu1 %1683 }
 0x728   :  { %v1690_v17 = vmul.f32 0.001953125, %v1684_v60 }
 0x72a   :  { %v1692_v2 = vsub.f32 %v1628_v44, %v1690_v17  ;;  %v1693_v26 = vsub.f32 %v1630_v46, %v1690_v17  ;;  %v1694_v18 = vsub.f32 %v1671_v8, %v1690_v17  ;;  %v1695_v7 = vsub.f32 %v1673_v29, %v1690_v17 }
 0x72b   :  { %v1689_v5 = vpop.xlane.xlu0 %1688 }
 0x72c   :  { %v1691_v24 = vmul.f32 0.001953125, %v1689_v5  ;;  %v1700_v31 = vmul.f32 %v1692_v2, %v1692_v2  ;;  %v1701_v14 = vmul.f32 %v1693_v26, %v1693_v26  ;;  %v1702_v12 = vmul.f32 %v1694_v18, %v1694_v18 }
 0x72d   :  { %v1703_v30 = vmul.f32 %v1695_v7, %v1695_v7 }
 0x72e   :  { %v1696_v63 = vsub.f32 %v1632_v49, %v1691_v24  ;;  %v1697_v20 = vsub.f32 %v1634_v0, %v1691_v24  ;;  %v1708_v9 = vadd.f32 %v1701_v14, %v1700_v31  ;;  %v1698_v11 = vsub.f32 %v1675_v10, %v1691_v24  ;;  %v1872_v49 = vld [vmem:[%s2493_s0] sm:$0xff]  ;;  %v1873_v0 = vld [vmem:[%s2493_s0 + $0x8] sm:$0xff] }
 0x72f   :  { %v1699_v56 = vsub.f32 %v1677_v61, %v1691_v24  ;;  %v1876_v31 = vld [vmem:[%s2493_s0 + $0x20] sm:$0xff] }
 0x730   :  { %v1709_v54 = vadd.f32 %v1708_v9, %v1702_v12  ;;  %v1704_v28 = vmul.f32 %v1696_v63, %v1696_v63  ;;  %v1705_v32 = vmul.f32 %v1697_v20, %v1697_v20  ;;  %v1706_v21 = vmul.f32 %v1698_v11, %v1698_v11  ;;  %v1877_v12 = vld [vmem:[%s2493_s0 + $0x28] sm:$0xff] }
 0x731   :  { %v1707_v13 = vmul.f32 %v1699_v56, %v1699_v56 }
 0x732   :  { %v1710_v19 = vadd.f32 %v1709_v54, %v1703_v30  ;;  %v1713_v41 = vadd.f32 %v1705_v32, %v1704_v28 }
 0x734   :  { %1711 = vadd.xlane.f32.xlu1 %v1710_v19  ;;  %v1714_v42 = vadd.f32 %v1713_v41, %v1706_v21 }
 0x736   :  { %v1715_v27 = vadd.f32 %v1714_v42, %v1707_v13 }
 0x738   :  { %1716 = vadd.xlane.f32.xlu1 %v1715_v27 }
 0x7bd   :  { %v1712_v58 = vpop.xlane.xlu1 %1711 }
 0x7be   :  { %v1718_v43 = vmul.f32 0.001953125, %v1712_v58 }
 0x7c0   :  { %v1722_v16 = vadd.f32 1e-05, %v1718_v43 }
 0x7c1   :  { %v1717_v47 = vpop.xlane.xlu1 %1716 }
 0x7c2   :  { %1868 = vrsqrt.f32 %v1722_v16  ;;  %v1719_v33 = vmul.f32 0.001953125, %v1717_v47 }
 0x7c4   :  { %v1723_v39 = vadd.f32 1e-05, %v1719_v33 }
 0x7c6   :  { %1870 = vrsqrt.f32 %v1723_v39 }
 0x7cf   :  { %v1869_v48 = vpop.eup %1868 }
 0x7d0   :  { %v1726_v62 = vmul.f32 %v1869_v48, %v1720_v45 }
 0x7d2   :  { %1730 = vperm.xlu1 %1862, %v1726_v62  }
 0x7d3   :  { %v1871_v1 = vpop.eup %1870 }
 0x7d4   :  { %v1727_v40 = vmul.f32 %v1871_v1, %v1721_v51 }
 0x7d6   :  { %1750 = vperm.xlu1 %1862, %v1746_v59   ;;  %1735 = vperm.xlu0 %1863, %v1727_v40  }
 0x7da   :  { %1755 = vperm.xlu1 %1862, %v1747_v57  }
 0x84d   :  { %v1731_v55 = vpop.permute.xlu1 %1730 }
 0x84e   :  { %v1738_v38 = vmul.f32 %v1731_v55, %v1692_v2  ;;  %v1739_v4 = vmul.f32 %v1731_v55, %v1693_v26  ;;  %v1740_v22 = vmul.f32 %v1731_v55, %v1694_v18  ;;  %v1741_v34 = vmul.f32 %v1731_v55, %v1695_v7 }
 0x851   :  { %v1736_v35 = vpop.permute.xlu0 %1735  ;;  %v1751_v36 = vpop.permute.xlu1 %1750 }
 0x852   :  { %v1758_v25 = vadd.f32 %v1751_v36, %v1738_v38  ;;  %v1759_v37 = vadd.f32 %v1751_v36, %v1739_v4  ;;  %v1760_v6 = vadd.f32 %v1751_v36, %v1740_v22  ;;  %v1761_v44 = vadd.f32 %v1751_v36, %v1741_v34 }
 0x853   :  { %v1742_v8 = vmul.f32 %v1736_v35, %v1696_v63  ;;  %v1743_v46 = vmul.f32 %v1736_v35, %v1697_v20  ;;  %v1744_v29 = vmul.f32 %v1736_v35, %v1698_v11  ;;  %v1745_v52 = vmul.f32 %v1736_v35, %v1699_v56  ;;  %v1878_v20 = vld [vmem:[%s2493_s0 + $0x30] sm:$0xff]  ;;  %v1879_v11 = vld [vmem:[%s2493_s0 + $0x38] sm:$0xff] }
 0x854   :  { %v1766_v50 = vadd.f32 %v1872_v49, %v1758_v25  ;;  %v1767_v10 = vadd.f32 %v1873_v0, %v1759_v37  ;;  %v1768_v3 = vadd.f32 %v1874_v53, %v1760_v6  ;;  %v1769_v61 = vadd.f32 %v1875_v23, %v1761_v44 }
 0x855   :  { %v1756_v15 = vpop.permute.xlu1 %1755 }
 0x856   :  { %v1762_v60 = vadd.f32 %v1756_v15, %v1742_v8  ;;  %v1763_v17 = vadd.f32 %v1756_v15, %v1743_v46  ;;  %v1764_v2 = vadd.f32 %v1756_v15, %v1744_v29  ;;  %v1765_v26 = vadd.f32 %v1756_v15, %v1745_v52 }
 0x857   :  { %v1774_v18 = vmax.f32 %v1766_v50, 0.0  ;;  %v1775_v5 = vmax.f32 %v1767_v10, 0.0  ;;  %v1776_v7 = vmax.f32 %v1768_v3, 0.0  ;;  %v1777_v24 = vmax.f32 %v1769_v61, 0.0 }
 0x858   :  { %v1770_v14 = vadd.f32 %v1876_v31, %v1762_v60  ;;  %v1771_v63 = vadd.f32 %v1877_v12, %v1763_v17  ;;  %v1772_v9 = vadd.f32 %v1878_v20, %v1764_v2  ;;  %v1773_v30 = vadd.f32 %v1879_v11, %v1765_v26 }
 0x859   :  { %1782 = vst [vmem:[%s2504_s11] sm:$0xff] %v1774_v18  ;;  %1783 = vst [vmem:[%s2504_s11 + $0x8] sm:$0xff] %v1775_v5 }
 0x85a   :  { %1784 = vst [vmem:[%s2504_s11 + $0x10] sm:$0xff] %v1776_v7  ;;  %1785 = vst [vmem:[%s2504_s11 + $0x18] sm:$0xff] %v1777_v24  ;;  %v1778_v54 = vmax.f32 %v1770_v14, 0.0  ;;  %v1779_v56 = vmax.f32 %v1771_v63, 0.0  ;;  %v1780_v28 = vmax.f32 %v1772_v9, 0.0  ;;  %v1781_v32 = vmax.f32 %v1773_v30, 0.0 }
 0x85c   :  { %1786 = vst [vmem:[%s2504_s11 + $0x20] sm:$0xff] %v1778_v54  ;;  %1787 = vst [vmem:[%s2504_s11 + $0x28] sm:$0xff] %v1779_v56 }
 0x85d   :  { %1788 = vst [vmem:[%s2504_s11 + $0x30] sm:$0xff] %v1780_v28  ;;  %1789 = vst [vmem:[%s2504_s11 + $0x38] sm:$0xff] %v1781_v32 }

</bundles_post_ra>
